<compile_context>
chip_gen: v6e
topology: v6e:2x2x1
jax: 0.10.0
libtpu: 0.0.40
codegen_flags: <defaults>
</compile_context>

<pallas_src>
import jax
import jax.numpy as jnp
from jax.experimental import pallas as pl
from jax.experimental.pallas import tpu as pltpu

# ----------------------------- config ---------------------------------------
B = 2                 # batch
N = 16                # sequence length (tokens)
EMBED = 64            # d_model
HEADS = 4             # nhead
HEAD_DIM = EMBED // HEADS
FF = 128              # dim_feedforward
LN_EPS = 1e-5
BN = B * N


# --------------------------- in-kernel math helpers --------------------------
def _erf(x):
    # Abramowitz & Stegun 7.1.26 (|err| <= 1.5e-7): reproduces torch's exact
    # erf-based GELU to float32 precision using only VPU/EUP ops.
    a1, a2, a3, a4, a5 = 0.254829592, -0.284496736, 1.421413741, -1.453152027, 1.061405429
    p = 0.3275911
    sgn = jnp.where(x >= 0.0, 1.0, -1.0)
    ax = jnp.abs(x)
    t = 1.0 / (1.0 + p * ax)
    poly = ((((a5 * t + a4) * t + a3) * t + a2) * t + a1) * t
    return sgn * (1.0 - poly * jnp.exp(-ax * ax))


def _gelu(x):
    return 0.5 * x * (1.0 + _erf(x * 0.7071067811865476))


def _layernorm(x, w, b):
    mu = jnp.mean(x, axis=-1, keepdims=True)
    var = jnp.mean(jnp.square(x - mu), axis=-1, keepdims=True)
    return (x - mu) * jax.lax.rsqrt(var + LN_EPS) * w + b


# ------------------------------- fused kernel --------------------------------
def encoder_layer_kernel(src_ref, wq_ref, wk_ref, wv_ref, wproj_ref, bproj_ref,
                         w1_ref, b1_ref, w2_ref, b2_ref,
                         lnp_w_ref, lnp_b_ref, ln1_w_ref, ln1_b_ref,
                         out_ref):
    x = src_ref[...]                                            # (B*N, C)

    # ----- self-attention branch (pre-norm); Dropout/DropPath = identity (eval) -----
    xn = _layernorm(x, lnp_w_ref[...], lnp_b_ref[...])
    q = jnp.dot(xn, wq_ref[...], preferred_element_type=jnp.float32)   # (B*N, C)
    k = jnp.dot(xn, wk_ref[...], preferred_element_type=jnp.float32)
    v = jnp.dot(xn, wv_ref[...], preferred_element_type=jnp.float32)

    q3 = q.reshape(B, N, EMBED)      # leading-dim split only (layout-safe)
    k3 = k.reshape(B, N, EMBED)
    v3 = v.reshape(B, N, EMBED)
    wproj = wproj_ref[...]

    scale = HEAD_DIM ** -0.5
    acc = jnp.zeros((BN, EMBED), jnp.float32)
    for h in range(HEADS):                                      # static unroll over 4 heads
        sl = slice(h * HEAD_DIM, (h + 1) * HEAD_DIM)
        qh, kh, vh = q3[:, :, sl], k3[:, :, sl], v3[:, :, sl]   # (B, N, d)
        s = jnp.einsum("bnd,bmd->bnm", qh, kh,
                       preferred_element_type=jnp.float32) * scale      # (B, N, N)
        s = s - jnp.max(s, axis=-1, keepdims=True)
        p = jnp.exp(s)
        p = p * pl.reciprocal(jnp.sum(p, axis=-1, keepdims=True), approx=True)
        oh = jnp.einsum("bnm,bmd->bnd", p, vh,
                        preferred_element_type=jnp.float32)              # (B, N, d)
        # Fused output projection: accumulate head @ Wproj[h*d:(h+1)*d, :] -> no concat.
        acc = acc + jnp.dot(oh.reshape(BN, HEAD_DIM), wproj[sl, :],
                            preferred_element_type=jnp.float32)
    attn = acc + bproj_ref[...]

    src1 = x + attn                                             # residual 1

    # ----- MLP branch; residual uses the *normed* src (matches the CCT layer) -----
    src1n = _layernorm(src1, ln1_w_ref[...], ln1_b_ref[...])
    h1 = _gelu(jnp.dot(src1n, w1_ref[...], preferred_element_type=jnp.float32) + b1_ref[...])
    h2 = jnp.dot(h1, w2_ref[...], preferred_element_type=jnp.float32) + b2_ref[...]
    out_ref[...] = src1n + h2

    # TODO(synk): Dropout / DropPath are train-time stochastic ops; eval-mode forward is identity.


# ------------------------------- wrapper --------------------------------------
def encoder_layer(src, params):
    """src: (B, N, EMBED) float32 -> (B, N, EMBED) float32."""
    src_flat = src.reshape(BN, EMBED)
    args = [src_flat,
            params["wq"], params["wk"], params["wv"],
            params["wproj"], params["bproj"],
            params["w1"], params["b1"], params["w2"], params["b2"],
            params["lnp_w"], params["lnp_b"], params["ln1_w"], params["ln1_b"]]

    out = pl.pallas_call(
        encoder_layer_kernel,
        out_shape=jax.ShapeDtypeStruct((BN, EMBED), jnp.float32),
        grid=(1,),
        in_specs=[pl.BlockSpec(a.shape, lambda i: (0, 0)) for a in args],
        out_specs=pl.BlockSpec((BN, EMBED), lambda i: (0, 0)),
        compiler_params=pltpu.CompilerParams(dimension_semantics=("arbitrary",)),
    )(*args)
    return out.reshape(B, N, EMBED)


# ------------------------------- parameters -----------------------------------
def init_params(key):
    ks = jax.random.split(key, 10)

    def w(k, shape, std=0.02):
        return jax.random.normal(k, shape, jnp.float32) * std

    # torch layouts: qkv.weight (3C, C) bias=False; proj (C, C); linear1 (FF, C); linear2 (C, FF).
    wqkv_t = w(ks[0], (3 * EMBED, EMBED))
    wproj_t = w(ks[1], (EMBED, EMBED))
    w1_t = w(ks[2], (FF, EMBED))
    w2_t = w(ks[3], (EMBED, FF))
    lnk = jax.random.split(ks[9], 4)
    return {
        # split + transpose to (in, out) in the wrapper/init (free) so the kernel never
        # slices a 192-lane qkv activation.
        "wq": wqkv_t[0:EMBED].T,
        "wk": wqkv_t[EMBED:2 * EMBED].T,
        "wv": wqkv_t[2 * EMBED:].T,
        "wproj": wproj_t.T,
        "bproj": w(ks[4], (1, EMBED)),
        "w1": w1_t.T,
        "b1": w(ks[5], (1, FF)),
        "w2": w2_t.T,
        "b2": w(ks[6], (1, EMBED)),
        "lnp_w": 1.0 + 0.1 * jax.random.normal(lnk[0], (1, EMBED), jnp.float32),
        "lnp_b": 0.1 * jax.random.normal(lnk[1], (1, EMBED), jnp.float32),
        "ln1_w": 1.0 + 0.1 * jax.random.normal(lnk[2], (1, EMBED), jnp.float32),
        "ln1_b": 0.1 * jax.random.normal(lnk[3], (1, EMBED), jnp.float32),
    }


# --------------------------- pure-JAX reference --------------------------------
def encoder_layer_ref(src, p):
    def ln(x, wt, bt):
        mu = jnp.mean(x, axis=-1, keepdims=True)
        var = jnp.mean(jnp.square(x - mu), axis=-1, keepdims=True)
        return (x - mu) / jnp.sqrt(var + LN_EPS) * wt + bt

    x = src                                                     # (B, N, C)
    xn = ln(x, p["lnp_w"], p["lnp_b"])
    q = xn @ p["wq"]
    k = xn @ p["wk"]
    v = xn @ p["wv"]

    def split(t):
        return t.reshape(B, N, HEADS, HEAD_DIM).transpose(0, 2, 1, 3)   # (B, H, N, d)

    qh, kh, vh = split(q), split(k), split(v)
    s = jnp.einsum("bhnd,bhmd->bhnm", qh, kh) * (HEAD_DIM ** -0.5)
    pa = jax.nn.softmax(s, axis=-1)
    o = jnp.einsum("bhnm,bhmd->bhnd", pa, vh)
    o = o.transpose(0, 2, 1, 3).reshape(B, N, EMBED)
    attn = o @ p["wproj"] + p["bproj"]

    src1 = x + attn
    src1n = ln(src1, p["ln1_w"], p["ln1_b"])
    h1 = jax.nn.gelu(src1n @ p["w1"] + p["b1"], approximate=False)
    h2 = h1 @ p["w2"] + p["b2"]
    return src1n + h2


# ------------------------------- main -----------------------------------------
if __name__ == "__main__":
    key = jax.random.PRNGKey(0)
    kx, kp = jax.random.split(key)
    src = jax.random.normal(kx, (B, N, EMBED), dtype=jnp.float32)
    params = init_params(kp)

    out = jax.jit(encoder_layer)(src, params)
    out = jax.block_until_ready(out)

    assert out.shape == (B, N, EMBED), out.shape
    assert bool(jnp.all(jnp.isfinite(out)))

    with jax.default_matmul_precision("highest"):
        ref = encoder_layer_ref(src, params)
    max_err = float(jnp.max(jnp.abs(out - ref)))
    assert max_err < 2e-2, f"max abs err {max_err}"

    print("KERNEL_OK")
</pallas_src>

<mosaic_0001>
module attributes {stable_mosaic.version = 11 : i64} {
  func.func @encoder_layer_kernel(%arg0: i32, %arg1: memref<32x64xf32, #tpu.memory_space<vmem>>, %arg2: memref<64x64xf32, #tpu.memory_space<vmem>>, %arg3: memref<64x64xf32, #tpu.memory_space<vmem>>, %arg4: memref<64x64xf32, #tpu.memory_space<vmem>>, %arg5: memref<64x64xf32, #tpu.memory_space<vmem>>, %arg6: memref<1x64xf32, #tpu.memory_space<vmem>>, %arg7: memref<64x128xf32, #tpu.memory_space<vmem>>, %arg8: memref<1x128xf32, #tpu.memory_space<vmem>>, %arg9: memref<128x64xf32, #tpu.memory_space<vmem>>, %arg10: memref<1x64xf32, #tpu.memory_space<vmem>>, %arg11: memref<1x64xf32, #tpu.memory_space<vmem>>, %arg12: memref<1x64xf32, #tpu.memory_space<vmem>>, %arg13: memref<1x64xf32, #tpu.memory_space<vmem>>, %arg14: memref<1x64xf32, #tpu.memory_space<vmem>>, %arg15: memref<32x64xf32, #tpu.memory_space<vmem>>) attributes {dimension_semantics = [#tpu.dimension_semantics<arbitrary>], iteration_bounds = array<i64: 1>, scalar_prefetch = 0 : i64, scratch_operands = 0 : i64, tpu.core_type = #tpu.core_type<tc>, window_params = [{pipeline_mode = #tpu.pipeline_mode<synchronous>, transform_indices = @transform_0, window_bounds = array<i64: 32, 64>}, {pipeline_mode = #tpu.pipeline_mode<synchronous>, transform_indices = @transform_1, window_bounds = array<i64: 64, 64>}, {pipeline_mode = #tpu.pipeline_mode<synchronous>, transform_indices = @transform_2, window_bounds = array<i64: 64, 64>}, {pipeline_mode = #tpu.pipeline_mode<synchronous>, transform_indices = @transform_3, window_bounds = array<i64: 64, 64>}, {pipeline_mode = #tpu.pipeline_mode<synchronous>, transform_indices = @transform_4, window_bounds = array<i64: 64, 64>}, {pipeline_mode = #tpu.pipeline_mode<synchronous>, transform_indices = @transform_5, window_bounds = array<i64: 1, 64>}, {pipeline_mode = #tpu.pipeline_mode<synchronous>, transform_indices = @transform_6, window_bounds = array<i64: 64, 128>}, {pipeline_mode = #tpu.pipeline_mode<synchronous>, transform_indices = @transform_7, window_bounds = array<i64: 1, 128>}, {pipeline_mode = #tpu.pipeline_mode<synchronous>, transform_indices = @transform_8, window_bounds = array<i64: 128, 64>}, {pipeline_mode = #tpu.pipeline_mode<synchronous>, transform_indices = @transform_9, window_bounds = array<i64: 1, 64>}, {pipeline_mode = #tpu.pipeline_mode<synchronous>, transform_indices = @transform_10, window_bounds = array<i64: 1, 64>}, {pipeline_mode = #tpu.pipeline_mode<synchronous>, transform_indices = @transform_11, window_bounds = array<i64: 1, 64>}, {pipeline_mode = #tpu.pipeline_mode<synchronous>, transform_indices = @transform_12, window_bounds = array<i64: 1, 64>}, {pipeline_mode = #tpu.pipeline_mode<synchronous>, transform_indices = @transform_13, window_bounds = array<i64: 1, 64>}, {pipeline_mode = #tpu.pipeline_mode<synchronous>, transform_indices = @transform_14, window_bounds = array<i64: 32, 64>}]} {
    %c0 = arith.constant 0 : index
    %c0_0 = arith.constant 0 : index
    %0 = vector.load %arg1[%c0, %c0_0] : memref<32x64xf32, #tpu.memory_space<vmem>>, vector<32x64xf32>
    %c0_1 = arith.constant 0 : index
    %c0_2 = arith.constant 0 : index
    %1 = vector.load %arg11[%c0_1, %c0_2] : memref<1x64xf32, #tpu.memory_space<vmem>>, vector<1x64xf32>
    %c0_3 = arith.constant 0 : index
    %c0_4 = arith.constant 0 : index
    %2 = vector.load %arg12[%c0_3, %c0_4] : memref<1x64xf32, #tpu.memory_space<vmem>>, vector<1x64xf32>
    %cst = arith.constant dense<0.000000e+00> : vector<32xf32>
    %3 = vector.multi_reduction <add>, %0, %cst [1] : vector<32x64xf32> to vector<32xf32>
    %4 = vector.shape_cast %3 : vector<32xf32> to vector<32x1xf32>
    %cst_5 = arith.constant 6.400000e+01 : f32
    %5 = vector.broadcast %cst_5 : f32 to vector<32x1xf32>
    %6 = arith.divf %4, %5 : vector<32x1xf32>
    %7 = vector.broadcast %6 : vector<32x1xf32> to vector<32x64xf32>
    %8 = arith.subf %0, %7 : vector<32x64xf32>
    %9 = arith.mulf %8, %8 : vector<32x64xf32>
    %cst_6 = arith.constant dense<0.000000e+00> : vector<32xf32>
    %10 = vector.multi_reduction <add>, %9, %cst_6 [1] : vector<32x64xf32> to vector<32xf32>
    %11 = vector.shape_cast %10 : vector<32xf32> to vector<32x1xf32>
    %cst_7 = arith.constant 6.400000e+01 : f32
    %12 = vector.broadcast %cst_7 : f32 to vector<32x1xf32>
    %13 = arith.divf %11, %12 : vector<32x1xf32>
    %14 = vector.broadcast %6 : vector<32x1xf32> to vector<32x64xf32>
    %15 = arith.subf %0, %14 : vector<32x64xf32>
    %cst_8 = arith.constant 9.99999974E-6 : f32
    %16 = vector.broadcast %cst_8 : f32 to vector<32x1xf32>
    %17 = arith.addf %13, %16 : vector<32x1xf32>
    %18 = math.rsqrt %17 : vector<32x1xf32>
    %19 = vector.broadcast %18 : vector<32x1xf32> to vector<32x64xf32>
    %20 = arith.mulf %15, %19 : vector<32x64xf32>
    %21 = vector.broadcast %1 : vector<1x64xf32> to vector<32x64xf32>
    %22 = arith.mulf %20, %21 : vector<32x64xf32>
    %23 = vector.broadcast %2 : vector<1x64xf32> to vector<32x64xf32>
    %24 = arith.addf %22, %23 : vector<32x64xf32>
    %c0_9 = arith.constant 0 : index
    %c0_10 = arith.constant 0 : index
    %25 = vector.load %arg2[%c0_9, %c0_10] : memref<64x64xf32, #tpu.memory_space<vmem>>, vector<64x64xf32>
    %cst_11 = arith.constant dense<0.000000e+00> : vector<32x64xf32>
    %26 = tpu.matmul %24, %25, %cst_11 {dimension_numbers = #tpu.dot_dimension_numbers<[1], [0], [0], [1], [0, 0, 1, 1], [], []>} : vector<32x64xf32>, vector<64x64xf32>, vector<32x64xf32> -> vector<32x64xf32>
    %c0_12 = arith.constant 0 : index
    %c0_13 = arith.constant 0 : index
    %27 = vector.load %arg3[%c0_12, %c0_13] : memref<64x64xf32, #tpu.memory_space<vmem>>, vector<64x64xf32>
    %cst_14 = arith.constant dense<0.000000e+00> : vector<32x64xf32>
    %28 = tpu.matmul %24, %27, %cst_14 {dimension_numbers = #tpu.dot_dimension_numbers<[1], [0], [0], [1], [0, 0, 1, 1], [], []>} : vector<32x64xf32>, vector<64x64xf32>, vector<32x64xf32> -> vector<32x64xf32>
    %c0_15 = arith.constant 0 : index
    %c0_16 = arith.constant 0 : index
    %29 = vector.load %arg4[%c0_15, %c0_16] : memref<64x64xf32, #tpu.memory_space<vmem>>, vector<64x64xf32>
    %cst_17 = arith.constant dense<0.000000e+00> : vector<32x64xf32>
    %30 = tpu.matmul %24, %29, %cst_17 {dimension_numbers = #tpu.dot_dimension_numbers<[1], [0], [0], [1], [0, 0, 1, 1], [], []>} : vector<32x64xf32>, vector<64x64xf32>, vector<32x64xf32> -> vector<32x64xf32>
    %31 = vector.shape_cast %26 : vector<32x64xf32> to vector<2x16x64xf32>
    %32 = vector.shape_cast %28 : vector<32x64xf32> to vector<2x16x64xf32>
    %33 = vector.shape_cast %30 : vector<32x64xf32> to vector<2x16x64xf32>
    %c0_18 = arith.constant 0 : index
    %c0_19 = arith.constant 0 : index
    %34 = vector.load %arg5[%c0_18, %c0_19] : memref<64x64xf32, #tpu.memory_space<vmem>>, vector<64x64xf32>
    %cst_20 = arith.constant 0.000000e+00 : f32
    %35 = vector.broadcast %cst_20 : f32 to vector<32x64xf32>
    %36 = vector.extract_strided_slice %31 {offsets = [0, 0, 0], sizes = [2, 16, 16], strides = [1, 1, 1]} : vector<2x16x64xf32> to vector<2x16x16xf32>
    %37 = vector.extract_strided_slice %32 {offsets = [0, 0, 0], sizes = [2, 16, 16], strides = [1, 1, 1]} : vector<2x16x64xf32> to vector<2x16x16xf32>
    %38 = vector.extract_strided_slice %33 {offsets = [0, 0, 0], sizes = [2, 16, 16], strides = [1, 1, 1]} : vector<2x16x64xf32> to vector<2x16x16xf32>
    "tpu.trace_start"() <{level = 10 : i32, message = "bnd,bmd->bnm"}> : () -> ()
    %cst_21 = arith.constant dense<0.000000e+00> : vector<2x16x16xf32>
    %39 = tpu.matmul %36, %37, %cst_21 {dimension_numbers = #tpu.dot_dimension_numbers<[2], [2], [1], [1], [0, 0, 0, 1, 1, 1], [0], [0]>} : vector<2x16x16xf32>, vector<2x16x16xf32>, vector<2x16x16xf32> -> vector<2x16x16xf32>
    "tpu.trace_stop"() : () -> ()
    %cst_22 = arith.constant 2.500000e-01 : f32
    %40 = vector.broadcast %cst_22 : f32 to vector<2x16x16xf32>
    %41 = arith.mulf %39, %40 : vector<2x16x16xf32>
    %cst_23 = arith.constant dense<0xFF800000> : vector<2x16xf32>
    %42 = vector.multi_reduction <maximumf>, %41, %cst_23 [2] : vector<2x16x16xf32> to vector<2x16xf32>
    %43 = vector.shape_cast %42 : vector<2x16xf32> to vector<2x16x1xf32>
    %44 = vector.broadcast %43 : vector<2x16x1xf32> to vector<2x16x16xf32>
    %45 = arith.subf %41, %44 : vector<2x16x16xf32>
    %46 = math.exp %45 : vector<2x16x16xf32>
    %cst_24 = arith.constant dense<0.000000e+00> : vector<2x16xf32>
    %47 = vector.multi_reduction <add>, %46, %cst_24 [2] : vector<2x16x16xf32> to vector<2x16xf32>
    %48 = vector.shape_cast %47 : vector<2x16xf32> to vector<2x16x1xf32>
    %49 = tpu.reciprocal %48 {approx = true} : vector<2x16x1xf32> -> vector<2x16x1xf32>
    %50 = vector.broadcast %49 : vector<2x16x1xf32> to vector<2x16x16xf32>
    %51 = arith.mulf %46, %50 : vector<2x16x16xf32>
    "tpu.trace_start"() <{level = 10 : i32, message = "bnm,bmd->bnd"}> : () -> ()
    %cst_25 = arith.constant dense<0.000000e+00> : vector<2x16x16xf32>
    %52 = tpu.matmul %51, %38, %cst_25 {dimension_numbers = #tpu.dot_dimension_numbers<[2], [1], [1], [2], [0, 0, 0, 1, 1, 2], [0], [0]>} : vector<2x16x16xf32>, vector<2x16x16xf32>, vector<2x16x16xf32> -> vector<2x16x16xf32>
    "tpu.trace_stop"() : () -> ()
    %53 = vector.shape_cast %52 : vector<2x16x16xf32> to vector<32x16xf32>
    %54 = vector.extract_strided_slice %34 {offsets = [0, 0], sizes = [16, 64], strides = [1, 1]} : vector<64x64xf32> to vector<16x64xf32>
    %cst_26 = arith.constant dense<0.000000e+00> : vector<32x64xf32>
    %55 = tpu.matmul %53, %54, %cst_26 {dimension_numbers = #tpu.dot_dimension_numbers<[1], [0], [0], [1], [0, 0, 1, 1], [], []>} : vector<32x16xf32>, vector<16x64xf32>, vector<32x64xf32> -> vector<32x64xf32>
    %56 = arith.addf %35, %55 : vector<32x64xf32>
    %57 = vector.extract_strided_slice %31 {offsets = [0, 0, 16], sizes = [2, 16, 16], strides = [1, 1, 1]} : vector<2x16x64xf32> to vector<2x16x16xf32>
    %58 = vector.extract_strided_slice %32 {offsets = [0, 0, 16], sizes = [2, 16, 16], strides = [1, 1, 1]} : vector<2x16x64xf32> to vector<2x16x16xf32>
    %59 = vector.extract_strided_slice %33 {offsets = [0, 0, 16], sizes = [2, 16, 16], strides = [1, 1, 1]} : vector<2x16x64xf32> to vector<2x16x16xf32>
    "tpu.trace_start"() <{level = 10 : i32, message = "bnd,bmd->bnm"}> : () -> ()
    %cst_27 = arith.constant dense<0.000000e+00> : vector<2x16x16xf32>
    %60 = tpu.matmul %57, %58, %cst_27 {dimension_numbers = #tpu.dot_dimension_numbers<[2], [2], [1], [1], [0, 0, 0, 1, 1, 1], [0], [0]>} : vector<2x16x16xf32>, vector<2x16x16xf32>, vector<2x16x16xf32> -> vector<2x16x16xf32>
    "tpu.trace_stop"() : () -> ()
    %cst_28 = arith.constant 2.500000e-01 : f32
    %61 = vector.broadcast %cst_28 : f32 to vector<2x16x16xf32>
    %62 = arith.mulf %60, %61 : vector<2x16x16xf32>
    %cst_29 = arith.constant dense<0xFF800000> : vector<2x16xf32>
    %63 = vector.multi_reduction <maximumf>, %62, %cst_29 [2] : vector<2x16x16xf32> to vector<2x16xf32>
    %64 = vector.shape_cast %63 : vector<2x16xf32> to vector<2x16x1xf32>
    %65 = vector.broadcast %64 : vector<2x16x1xf32> to vector<2x16x16xf32>
    %66 = arith.subf %62, %65 : vector<2x16x16xf32>
    %67 = math.exp %66 : vector<2x16x16xf32>
    %cst_30 = arith.constant dense<0.000000e+00> : vector<2x16xf32>
    %68 = vector.multi_reduction <add>, %67, %cst_30 [2] : vector<2x16x16xf32> to vector<2x16xf32>
    %69 = vector.shape_cast %68 : vector<2x16xf32> to vector<2x16x1xf32>
    %70 = tpu.reciprocal %69 {approx = true} : vector<2x16x1xf32> -> vector<2x16x1xf32>
    %71 = vector.broadcast %70 : vector<2x16x1xf32> to vector<2x16x16xf32>
    %72 = arith.mulf %67, %71 : vector<2x16x16xf32>
    "tpu.trace_start"() <{level = 10 : i32, message = "bnm,bmd->bnd"}> : () -> ()
    %cst_31 = arith.constant dense<0.000000e+00> : vector<2x16x16xf32>
    %73 = tpu.matmul %72, %59, %cst_31 {dimension_numbers = #tpu.dot_dimension_numbers<[2], [1], [1], [2], [0, 0, 0, 1, 1, 2], [0], [0]>} : vector<2x16x16xf32>, vector<2x16x16xf32>, vector<2x16x16xf32> -> vector<2x16x16xf32>
    "tpu.trace_stop"() : () -> ()
    %74 = vector.shape_cast %73 : vector<2x16x16xf32> to vector<32x16xf32>
    %75 = vector.extract_strided_slice %34 {offsets = [16, 0], sizes = [16, 64], strides = [1, 1]} : vector<64x64xf32> to vector<16x64xf32>
    %cst_32 = arith.constant dense<0.000000e+00> : vector<32x64xf32>
    %76 = tpu.matmul %74, %75, %cst_32 {dimension_numbers = #tpu.dot_dimension_numbers<[1], [0], [0], [1], [0, 0, 1, 1], [], []>} : vector<32x16xf32>, vector<16x64xf32>, vector<32x64xf32> -> vector<32x64xf32>
    %77 = arith.addf %56, %76 : vector<32x64xf32>
    %78 = vector.extract_strided_slice %31 {offsets = [0, 0, 32], sizes = [2, 16, 16], strides = [1, 1, 1]} : vector<2x16x64xf32> to vector<2x16x16xf32>
    %79 = vector.extract_strided_slice %32 {offsets = [0, 0, 32], sizes = [2, 16, 16], strides = [1, 1, 1]} : vector<2x16x64xf32> to vector<2x16x16xf32>
    %80 = vector.extract_strided_slice %33 {offsets = [0, 0, 32], sizes = [2, 16, 16], strides = [1, 1, 1]} : vector<2x16x64xf32> to vector<2x16x16xf32>
    "tpu.trace_start"() <{level = 10 : i32, message = "bnd,bmd->bnm"}> : () -> ()
    %cst_33 = arith.constant dense<0.000000e+00> : vector<2x16x16xf32>
    %81 = tpu.matmul %78, %79, %cst_33 {dimension_numbers = #tpu.dot_dimension_numbers<[2], [2], [1], [1], [0, 0, 0, 1, 1, 1], [0], [0]>} : vector<2x16x16xf32>, vector<2x16x16xf32>, vector<2x16x16xf32> -> vector<2x16x16xf32>
    "tpu.trace_stop"() : () -> ()
    %cst_34 = arith.constant 2.500000e-01 : f32
    %82 = vector.broadcast %cst_34 : f32 to vector<2x16x16xf32>
    %83 = arith.mulf %81, %82 : vector<2x16x16xf32>
    %cst_35 = arith.constant dense<0xFF800000> : vector<2x16xf32>
    %84 = vector.multi_reduction <maximumf>, %83, %cst_35 [2] : vector<2x16x16xf32> to vector<2x16xf32>
    %85 = vector.shape_cast %84 : vector<2x16xf32> to vector<2x16x1xf32>
    %86 = vector.broadcast %85 : vector<2x16x1xf32> to vector<2x16x16xf32>
    %87 = arith.subf %83, %86 : vector<2x16x16xf32>
    %88 = math.exp %87 : vector<2x16x16xf32>
    %cst_36 = arith.constant dense<0.000000e+00> : vector<2x16xf32>
    %89 = vector.multi_reduction <add>, %88, %cst_36 [2] : vector<2x16x16xf32> to vector<2x16xf32>
    %90 = vector.shape_cast %89 : vector<2x16xf32> to vector<2x16x1xf32>
    %91 = tpu.reciprocal %90 {approx = true} : vector<2x16x1xf32> -> vector<2x16x1xf32>
    %92 = vector.broadcast %91 : vector<2x16x1xf32> to vector<2x16x16xf32>
    %93 = arith.mulf %88, %92 : vector<2x16x16xf32>
    "tpu.trace_start"() <{level = 10 : i32, message = "bnm,bmd->bnd"}> : () -> ()
    %cst_37 = arith.constant dense<0.000000e+00> : vector<2x16x16xf32>
    %94 = tpu.matmul %93, %80, %cst_37 {dimension_numbers = #tpu.dot_dimension_numbers<[2], [1], [1], [2], [0, 0, 0, 1, 1, 2], [0], [0]>} : vector<2x16x16xf32>, vector<2x16x16xf32>, vector<2x16x16xf32> -> vector<2x16x16xf32>
    "tpu.trace_stop"() : () -> ()
    %95 = vector.shape_cast %94 : vector<2x16x16xf32> to vector<32x16xf32>
    %96 = vector.extract_strided_slice %34 {offsets = [32, 0], sizes = [16, 64], strides = [1, 1]} : vector<64x64xf32> to vector<16x64xf32>
    %cst_38 = arith.constant dense<0.000000e+00> : vector<32x64xf32>
    %97 = tpu.matmul %95, %96, %cst_38 {dimension_numbers = #tpu.dot_dimension_numbers<[1], [0], [0], [1], [0, 0, 1, 1], [], []>} : vector<32x16xf32>, vector<16x64xf32>, vector<32x64xf32> -> vector<32x64xf32>
    %98 = arith.addf %77, %97 : vector<32x64xf32>
    %99 = vector.extract_strided_slice %31 {offsets = [0, 0, 48], sizes = [2, 16, 16], strides = [1, 1, 1]} : vector<2x16x64xf32> to vector<2x16x16xf32>
    %100 = vector.extract_strided_slice %32 {offsets = [0, 0, 48], sizes = [2, 16, 16], strides = [1, 1, 1]} : vector<2x16x64xf32> to vector<2x16x16xf32>
    %101 = vector.extract_strided_slice %33 {offsets = [0, 0, 48], sizes = [2, 16, 16], strides = [1, 1, 1]} : vector<2x16x64xf32> to vector<2x16x16xf32>
    "tpu.trace_start"() <{level = 10 : i32, message = "bnd,bmd->bnm"}> : () -> ()
    %cst_39 = arith.constant dense<0.000000e+00> : vector<2x16x16xf32>
    %102 = tpu.matmul %99, %100, %cst_39 {dimension_numbers = #tpu.dot_dimension_numbers<[2], [2], [1], [1], [0, 0, 0, 1, 1, 1], [0], [0]>} : vector<2x16x16xf32>, vector<2x16x16xf32>, vector<2x16x16xf32> -> vector<2x16x16xf32>
    "tpu.trace_stop"() : () -> ()
    %cst_40 = arith.constant 2.500000e-01 : f32
    %103 = vector.broadcast %cst_40 : f32 to vector<2x16x16xf32>
    %104 = arith.mulf %102, %103 : vector<2x16x16xf32>
    %cst_41 = arith.constant dense<0xFF800000> : vector<2x16xf32>
    %105 = vector.multi_reduction <maximumf>, %104, %cst_41 [2] : vector<2x16x16xf32> to vector<2x16xf32>
    %106 = vector.shape_cast %105 : vector<2x16xf32> to vector<2x16x1xf32>
    %107 = vector.broadcast %106 : vector<2x16x1xf32> to vector<2x16x16xf32>
    %108 = arith.subf %104, %107 : vector<2x16x16xf32>
    %109 = math.exp %108 : vector<2x16x16xf32>
    %cst_42 = arith.constant dense<0.000000e+00> : vector<2x16xf32>
    %110 = vector.multi_reduction <add>, %109, %cst_42 [2] : vector<2x16x16xf32> to vector<2x16xf32>
    %111 = vector.shape_cast %110 : vector<2x16xf32> to vector<2x16x1xf32>
    %112 = tpu.reciprocal %111 {approx = true} : vector<2x16x1xf32> -> vector<2x16x1xf32>
    %113 = vector.broadcast %112 : vector<2x16x1xf32> to vector<2x16x16xf32>
    %114 = arith.mulf %109, %113 : vector<2x16x16xf32>
    "tpu.trace_start"() <{level = 10 : i32, message = "bnm,bmd->bnd"}> : () -> ()
    %cst_43 = arith.constant dense<0.000000e+00> : vector<2x16x16xf32>
    %115 = tpu.matmul %114, %101, %cst_43 {dimension_numbers = #tpu.dot_dimension_numbers<[2], [1], [1], [2], [0, 0, 0, 1, 1, 2], [0], [0]>} : vector<2x16x16xf32>, vector<2x16x16xf32>, vector<2x16x16xf32> -> vector<2x16x16xf32>
    "tpu.trace_stop"() : () -> ()
    %116 = vector.shape_cast %115 : vector<2x16x16xf32> to vector<32x16xf32>
    %117 = vector.extract_strided_slice %34 {offsets = [48, 0], sizes = [16, 64], strides = [1, 1]} : vector<64x64xf32> to vector<16x64xf32>
    %cst_44 = arith.constant dense<0.000000e+00> : vector<32x64xf32>
    %118 = tpu.matmul %116, %117, %cst_44 {dimension_numbers = #tpu.dot_dimension_numbers<[1], [0], [0], [1], [0, 0, 1, 1], [], []>} : vector<32x16xf32>, vector<16x64xf32>, vector<32x64xf32> -> vector<32x64xf32>
    %119 = arith.addf %98, %118 : vector<32x64xf32>
    %c0_45 = arith.constant 0 : index
    %c0_46 = arith.constant 0 : index
    %120 = vector.load %arg6[%c0_45, %c0_46] : memref<1x64xf32, #tpu.memory_space<vmem>>, vector<1x64xf32>
    %121 = vector.broadcast %120 : vector<1x64xf32> to vector<32x64xf32>
    %122 = arith.addf %119, %121 : vector<32x64xf32>
    %123 = arith.addf %0, %122 : vector<32x64xf32>
    %c0_47 = arith.constant 0 : index
    %c0_48 = arith.constant 0 : index
    %124 = vector.load %arg13[%c0_47, %c0_48] : memref<1x64xf32, #tpu.memory_space<vmem>>, vector<1x64xf32>
    %c0_49 = arith.constant 0 : index
    %c0_50 = arith.constant 0 : index
    %125 = vector.load %arg14[%c0_49, %c0_50] : memref<1x64xf32, #tpu.memory_space<vmem>>, vector<1x64xf32>
    %cst_51 = arith.constant dense<0.000000e+00> : vector<32xf32>
    %126 = vector.multi_reduction <add>, %123, %cst_51 [1] : vector<32x64xf32> to vector<32xf32>
    %127 = vector.shape_cast %126 : vector<32xf32> to vector<32x1xf32>
    %cst_52 = arith.constant 6.400000e+01 : f32
    %128 = vector.broadcast %cst_52 : f32 to vector<32x1xf32>
    %129 = arith.divf %127, %128 : vector<32x1xf32>
    %130 = vector.broadcast %129 : vector<32x1xf32> to vector<32x64xf32>
    %131 = arith.subf %123, %130 : vector<32x64xf32>
    %132 = arith.mulf %131, %131 : vector<32x64xf32>
    %cst_53 = arith.constant dense<0.000000e+00> : vector<32xf32>
    %133 = vector.multi_reduction <add>, %132, %cst_53 [1] : vector<32x64xf32> to vector<32xf32>
    %134 = vector.shape_cast %133 : vector<32xf32> to vector<32x1xf32>
    %cst_54 = arith.constant 6.400000e+01 : f32
    %135 = vector.broadcast %cst_54 : f32 to vector<32x1xf32>
    %136 = arith.divf %134, %135 : vector<32x1xf32>
    %137 = vector.broadcast %129 : vector<32x1xf32> to vector<32x64xf32>
    %138 = arith.subf %123, %137 : vector<32x64xf32>
    %cst_55 = arith.constant 9.99999974E-6 : f32
    %139 = vector.broadcast %cst_55 : f32 to vector<32x1xf32>
    %140 = arith.addf %136, %139 : vector<32x1xf32>
    %141 = math.rsqrt %140 : vector<32x1xf32>
    %142 = vector.broadcast %141 : vector<32x1xf32> to vector<32x64xf32>
    %143 = arith.mulf %138, %142 : vector<32x64xf32>
    %144 = vector.broadcast %124 : vector<1x64xf32> to vector<32x64xf32>
    %145 = arith.mulf %143, %144 : vector<32x64xf32>
    %146 = vector.broadcast %125 : vector<1x64xf32> to vector<32x64xf32>
    %147 = arith.addf %145, %146 : vector<32x64xf32>
    %c0_56 = arith.constant 0 : index
    %c0_57 = arith.constant 0 : index
    %148 = vector.load %arg7[%c0_56, %c0_57] : memref<64x128xf32, #tpu.memory_space<vmem>>, vector<64x128xf32>
    %cst_58 = arith.constant dense<0.000000e+00> : vector<32x128xf32>
    %149 = tpu.matmul %147, %148, %cst_58 {dimension_numbers = #tpu.dot_dimension_numbers<[1], [0], [0], [1], [0, 0, 1, 1], [], []>} : vector<32x64xf32>, vector<64x128xf32>, vector<32x128xf32> -> vector<32x128xf32>
    %c0_59 = arith.constant 0 : index
    %c0_60 = arith.constant 0 : index
    %150 = vector.load %arg8[%c0_59, %c0_60] : memref<1x128xf32, #tpu.memory_space<vmem>>, vector<1x128xf32>
    %151 = vector.broadcast %150 : vector<1x128xf32> to vector<32x128xf32>
    %152 = arith.addf %149, %151 : vector<32x128xf32>
    %cst_61 = arith.constant 5.000000e-01 : f32
    %153 = vector.broadcast %cst_61 : f32 to vector<32x128xf32>
    %154 = arith.mulf %153, %152 : vector<32x128xf32>
    %cst_62 = arith.constant 0.707106769 : f32
    %155 = vector.broadcast %cst_62 : f32 to vector<32x128xf32>
    %156 = arith.mulf %152, %155 : vector<32x128xf32>
    %cst_63 = arith.constant 0.000000e+00 : f32
    %157 = vector.broadcast %cst_63 : f32 to vector<32x128xf32>
    %158 = arith.cmpf oge, %156, %157 : vector<32x128xf32>
    %cst_64 = arith.constant 1.000000e+00 : f32
    %cst_65 = arith.constant -1.000000e+00 : f32
    %159 = vector.broadcast %cst_64 : f32 to vector<32x128xf32>
    %160 = vector.broadcast %cst_65 : f32 to vector<32x128xf32>
    %161 = arith.select %158, %159, %160 : vector<32x128xi1>, vector<32x128xf32>
    %162 = math.absf %156 : vector<32x128xf32>
    %cst_66 = arith.constant 0.327591091 : f32
    %163 = vector.broadcast %cst_66 : f32 to vector<32x128xf32>
    %164 = arith.mulf %163, %162 : vector<32x128xf32>
    %cst_67 = arith.constant 1.000000e+00 : f32
    %165 = vector.broadcast %cst_67 : f32 to vector<32x128xf32>
    %166 = arith.addf %165, %164 : vector<32x128xf32>
    %cst_68 = arith.constant 1.000000e+00 : f32
    %167 = vector.broadcast %cst_68 : f32 to vector<32x128xf32>
    %168 = arith.divf %167, %166 : vector<32x128xf32>
    %cst_69 = arith.constant 1.06140542 : f32
    %169 = vector.broadcast %cst_69 : f32 to vector<32x128xf32>
    %170 = arith.mulf %169, %168 : vector<32x128xf32>
    %cst_70 = arith.constant -1.45315206 : f32
    %171 = vector.broadcast %cst_70 : f32 to vector<32x128xf32>
    %172 = arith.addf %170, %171 : vector<32x128xf32>
    %173 = arith.mulf %172, %168 : vector<32x128xf32>
    %cst_71 = arith.constant 1.42141378 : f32
    %174 = vector.broadcast %cst_71 : f32 to vector<32x128xf32>
    %175 = arith.addf %173, %174 : vector<32x128xf32>
    %176 = arith.mulf %175, %168 : vector<32x128xf32>
    %cst_72 = arith.constant -0.284496725 : f32
    %177 = vector.broadcast %cst_72 : f32 to vector<32x128xf32>
    %178 = arith.addf %176, %177 : vector<32x128xf32>
    %179 = arith.mulf %178, %168 : vector<32x128xf32>
    %cst_73 = arith.constant 0.254829586 : f32
    %180 = vector.broadcast %cst_73 : f32 to vector<32x128xf32>
    %181 = arith.addf %179, %180 : vector<32x128xf32>
    %182 = arith.mulf %181, %168 : vector<32x128xf32>
    %cst_74 = arith.constant 0.000000e+00 : f32
    %183 = vector.broadcast %cst_74 : f32 to vector<32x128xf32>
    %184 = arith.subf %183, %162 : vector<32x128xf32>
    %185 = arith.mulf %184, %162 : vector<32x128xf32>
    %186 = math.exp %185 : vector<32x128xf32>
    %187 = arith.mulf %182, %186 : vector<32x128xf32>
    %cst_75 = arith.constant 1.000000e+00 : f32
    %188 = vector.broadcast %cst_75 : f32 to vector<32x128xf32>
    %189 = arith.subf %188, %187 : vector<32x128xf32>
    %190 = arith.mulf %161, %189 : vector<32x128xf32>
    %cst_76 = arith.constant 1.000000e+00 : f32
    %191 = vector.broadcast %cst_76 : f32 to vector<32x128xf32>
    %192 = arith.addf %191, %190 : vector<32x128xf32>
    %193 = arith.mulf %154, %192 : vector<32x128xf32>
    %c0_77 = arith.constant 0 : index
    %c0_78 = arith.constant 0 : index
    %194 = vector.load %arg9[%c0_77, %c0_78] : memref<128x64xf32, #tpu.memory_space<vmem>>, vector<128x64xf32>
    %cst_79 = arith.constant dense<0.000000e+00> : vector<32x64xf32>
    %195 = tpu.matmul %193, %194, %cst_79 {dimension_numbers = #tpu.dot_dimension_numbers<[1], [0], [0], [1], [0, 0, 1, 1], [], []>} : vector<32x128xf32>, vector<128x64xf32>, vector<32x64xf32> -> vector<32x64xf32>
    %c0_80 = arith.constant 0 : index
    %c0_81 = arith.constant 0 : index
    %196 = vector.load %arg10[%c0_80, %c0_81] : memref<1x64xf32, #tpu.memory_space<vmem>>, vector<1x64xf32>
    %197 = vector.broadcast %196 : vector<1x64xf32> to vector<32x64xf32>
    %198 = arith.addf %195, %197 : vector<32x64xf32>
    %199 = arith.addf %147, %198 : vector<32x64xf32>
    %c0_82 = arith.constant 0 : index
    %c0_83 = arith.constant 0 : index
    %200 = vector.load %arg15[%c0_82, %c0_83] : memref<32x64xf32, #tpu.memory_space<vmem>>, vector<32x64xf32>
    tpu.vector_store %arg15[%c0_82, %c0_83], %199 {strides = array<i32>} : memref<32x64xf32, #tpu.memory_space<vmem>>, vector<32x64xf32>,
    return
  }
  func.func @transform_0(%arg0: i32) -> (i32, i32) {
    %c0_i32 = arith.constant 0 : i32
    %c0_i32_0 = arith.constant 0 : i32
    %c0_i32_1 = arith.constant 0 : i32
    return %c0_i32, %c0_i32_0 : i32, i32
  }
  func.func @transform_1(%arg0: i32) -> (i32, i32) {
    %c0_i32 = arith.constant 0 : i32
    %c0_i32_0 = arith.constant 0 : i32
    %c0_i32_1 = arith.constant 0 : i32
    return %c0_i32, %c0_i32_0 : i32, i32
  }
  func.func @transform_2(%arg0: i32) -> (i32, i32) {
    %c0_i32 = arith.constant 0 : i32
    %c0_i32_0 = arith.constant 0 : i32
    %c0_i32_1 = arith.constant 0 : i32
    return %c0_i32, %c0_i32_0 : i32, i32
  }
  func.func @transform_3(%arg0: i32) -> (i32, i32) {
    %c0_i32 = arith.constant 0 : i32
    %c0_i32_0 = arith.constant 0 : i32
    %c0_i32_1 = arith.constant 0 : i32
    return %c0_i32, %c0_i32_0 : i32, i32
  }
  func.func @transform_4(%arg0: i32) -> (i32, i32) {
    %c0_i32 = arith.constant 0 : i32
    %c0_i32_0 = arith.constant 0 : i32
    %c0_i32_1 = arith.constant 0 : i32
    return %c0_i32, %c0_i32_0 : i32, i32
  }
  func.func @transform_5(%arg0: i32) -> (i32, i32) {
    %c0_i32 = arith.constant 0 : i32
    %c0_i32_0 = arith.constant 0 : i32
    %c0_i32_1 = arith.constant 0 : i32
    return %c0_i32, %c0_i32_0 : i32, i32
  }
  func.func @transform_6(%arg0: i32) -> (i32, i32) {
    %c0_i32 = arith.constant 0 : i32
    %c0_i32_0 = arith.constant 0 : i32
    %c0_i32_1 = arith.constant 0 : i32
    return %c0_i32, %c0_i32_0 : i32, i32
  }
  func.func @transform_7(%arg0: i32) -> (i32, i32) {
    %c0_i32 = arith.constant 0 : i32
    %c0_i32_0 = arith.constant 0 : i32
    %c0_i32_1 = arith.constant 0 : i32
    return %c0_i32, %c0_i32_0 : i32, i32
  }
  func.func @transform_8(%arg0: i32) -> (i32, i32) {
    %c0_i32 = arith.constant 0 : i32
    %c0_i32_0 = arith.constant 0 : i32
    %c0_i32_1 = arith.constant 0 : i32
    return %c0_i32, %c0_i32_0 : i32, i32
  }
  func.func @transform_9(%arg0: i32) -> (i32, i32) {
    %c0_i32 = arith.constant 0 : i32
    %c0_i32_0 = arith.constant 0 : i32
    %c0_i32_1 = arith.constant 0 : i32
    return %c0_i32, %c0_i32_0 : i32, i32
  }
  func.func @transform_10(%arg0: i32) -> (i32, i32) {
    %c0_i32 = arith.constant 0 : i32
    %c0_i32_0 = arith.constant 0 : i32
    %c0_i32_1 = arith.constant 0 : i32
    return %c0_i32, %c0_i32_0 : i32, i32
  }
  func.func @transform_11(%arg0: i32) -> (i32, i32) {
    %c0_i32 = arith.constant 0 : i32
    %c0_i32_0 = arith.constant 0 : i32
    %c0_i32_1 = arith.constant 0 : i32
    return %c0_i32, %c0_i32_0 : i32, i32
  }
  func.func @transform_12(%arg0: i32) -> (i32, i32) {
    %c0_i32 = arith.constant 0 : i32
    %c0_i32_0 = arith.constant 0 : i32
    %c0_i32_1 = arith.constant 0 : i32
    return %c0_i32, %c0_i32_0 : i32, i32
  }
  func.func @transform_13(%arg0: i32) -> (i32, i32) {
    %c0_i32 = arith.constant 0 : i32
    %c0_i32_0 = arith.constant 0 : i32
    %c0_i32_1 = arith.constant 0 : i32
    return %c0_i32, %c0_i32_0 : i32, i32
  }
  func.func @transform_14(%arg0: i32) -> (i32, i32) {
    %c0_i32 = arith.constant 0 : i32
    %c0_i32_0 = arith.constant 0 : i32
    %c0_i32_1 = arith.constant 0 : i32
    return %c0_i32, %c0_i32_0 : i32, i32
  }
}

</mosaic_0001>

<bundles_post_ra>
// kernel: encoder_layer.1
= control target key start
LH: loop header
LB: loop body
LE: loop exit
PB: predicated region body
PF: predicated region fallthrough
CT: control target
= control target key end

     0   :  { %19 = vsyncpa [#allocation3], 0  ;;  %s4262_s0 = inlined_call_operand.hbm [shape: f32[32,64], index: 0, kind: input, shape index: {}]   ;;  %s4263_s1 = inlined_call_operand.vmem [shape: f32[64,64], index: 1, kind: input, shape index: {}]   ;;  %s4264_s2 = inlined_call_operand.vmem [shape: f32[64,64], index: 2, kind: input, shape index: {}]   ;;  %s4265_s3 = inlined_call_operand.vmem [shape: f32[64,64], index: 3, kind: input, shape index: {}]   ;;  %s4266_s4 = inlined_call_operand.hbm [shape: f32[64,64], index: 4, kind: input, shape index: {}]   ;;  %s4267_s5 = inlined_call_operand.vmem [shape: f32[1,64], index: 5, kind: input, shape index: {}]   ;;  %s4268_s6 = inlined_call_operand.hbm [shape: f32[64,128], index: 6, kind: input, shape index: {}]   ;;  %s4269_s7 = inlined_call_operand.vmem [shape: f32[1,128], index: 7, kind: input, shape index: {}]   ;;  %s4270_s8 = inlined_call_operand.vmem [shape: f32[128,64], index: 8, kind: input, shape index: {}]   ;;  %s4271_s9 = inlined_call_operand.vmem [shape: f32[1,64], index: 9, kind: input, shape index: {}]   ;;  %s4272_s10 = inlined_call_operand.vmem [shape: f32[1,64], index: 10, kind: input, shape index: {}]   ;;  %s4273_s11 = inlined_call_operand.vmem [shape: f32[1,64], index: 11, kind: input, shape index: {}]   ;;  %s4274_s12 = inlined_call_operand.vmem [shape: f32[1,64], index: 12, kind: input, shape index: {}]   ;;  %s4275_s13 = inlined_call_operand.vmem [shape: f32[1,64], index: 13, kind: input, shape index: {}]   ;;  %s4276_s14 = inlined_call_operand.hbm [shape: f32[32,64], index: 14, kind: output, shape index: {}]  }
   0x1   :  { %20 = vsyncpa [#allocation6], 0 }
   0x2   :  { %21 = vsyncpa [#allocation4], 0  ;;  %s3625_s29 = smov [#allocation5]   ;;  %s3626_s15 = smov [#allocation2]  }
   0x3   :  { %s45_s30 = sshll.u32 %s3625_s29, 4  ;;  %s27_s16 = sshll.u32 %s3626_s15, 4  ;;  %s46_s30 = int_to_ptr.vmem [resolvable:$true] %s45_s30  ;;  %s28_s16 = int_to_ptr.vmem [resolvable:$true] %s27_s16 }
   0x4   :  { %s3547_s17 = scalar_lea.vmem %s46_s30, 1024  ;;  %p3552_p1 = scmp.lt.s32.totalorder %s46_s30, %s46_s30 }
   0x5   :  { %p3548_p0 = scmp.ne.s32.totalorder %s46_s30, %s3547_s17  ;;  %p3553_p2 = scmp.lt.s32.totalorder %s3547_s17, %s3547_s17 }
   0x7   :  { %p3554_p3 = por %p3553_p2, %p3552_p1 }
   0x9   :  { %p3555_p4 = pnand %p3554_p3, %p3548_p0 }
   0xb   :  { %3558 = shalt.err (!%p3555_p4)
}
   0xc   :  { %s3627_s18 = smov 128   ;;  %s3628_s19 = smov 8  }
   0xd   :  { %51 = dma.hbm_to_vmem [thread:$0]  %s4266_s4, 1024, %s46_s30, [#allocation6], %s3627_s18, %s3627_s18, %s3628_s19  }
   0xe   :  { %s3567_s22 = scalar_lea.vmem %s28_s16, 512  ;;  %p3572_p6 = scmp.lt.s32.totalorder %s28_s16, %s28_s16 }
   0xf   :  { %p3568_p5 = scmp.ne.s32.totalorder %s28_s16, %s3567_s22  ;;  %p3573_p7 = scmp.lt.s32.totalorder %s3567_s22, %s3567_s22 }
  0x11   :  { %p3574_p8 = por %p3573_p7, %p3572_p6 }
  0x13   :  { %p3575_p9 = pnand %p3574_p8, %p3568_p5 }
  0x15   :  { %3578 = shalt.err (!%p3575_p9)
}
  0x16   :  { %33 = dma.hbm_to_vmem [thread:$0]  %s4262_s0, 512, %s28_s16, [#allocation3], %s3627_s18, %s3627_s18, %s3628_s19  }
  0x17   :  { %s3629_s25 = smov [#allocation7]  }
  0x18   :  { %s59_s26 = sshll.u32 %s3629_s25, 4  ;;  %s60_s26 = int_to_ptr.vmem [resolvable:$true] %s59_s26 }
  0x19   :  { %s3587_s27 = scalar_lea.vmem %s60_s26, 1024  ;;  %p3592_p11 = scmp.lt.s32.totalorder %s60_s26, %s60_s26 }
  0x1a   :  { %p3588_p10 = scmp.ne.s32.totalorder %s60_s26, %s3587_s27  ;;  %p3593_p12 = scmp.lt.s32.totalorder %s3587_s27, %s3587_s27 }
  0x1c   :  { %p3594_p13 = por %p3593_p12, %p3592_p11 }
  0x1e   :  { %p3595_p0 = pnand %p3594_p13, %p3588_p10 }
  0x20   :  { %3598 = shalt.err (!%p3595_p0)
}
  0x21   :  { %65 = dma.hbm_to_vmem [thread:$0]  %s4268_s6, 1024, %s60_s26, [#allocation6], %s3627_s18, %s3627_s18, %s3628_s19  }
  0x22   :  { %3619 = dma.done.wait [#allocation3], 512  }
  0x23   :  { %3620 = vsyncadd [#allocation3], 4294966784 }
  0x24   :  { %3621 = dma.done.wait [#allocation6], 2048  }
  0x25   :  { %3622 = vsyncadd [#allocation6], 4294965248  ;;  %vm95_vm0 = vcmask 523264   ;;  %v89_v0 = vld [vmem:[#allocation2] sm:$0xff]  ;;  %v91_v1 = vld [vmem:[#allocation2 + $0x10] sm:$0xff]  ;;  %vm468_vm1 = vcmask 130048  }
  0x26   :  { %v90_v2 = vld [vmem:[#allocation2 + $0x8] sm:$0xff]  ;;  %v96_v3 = vsel %vm95_vm0, %v89_v0, 0.0  ;;  %v102_v4 = vsel %vm95_vm0, %v91_v1, 0.0  ;;  %v92_v5 = vld [vmem:[#allocation2 + $0x18] sm:$0xff]  ;;  %v175_v30 = vld [vmem:[%s4263_s1 + $0x30] sm:$0xff]  ;;  %s3631_s27 = smov 96  }
  0x27   :  { %97 = vadd.xlane.f32.xlu0 %v96_v3  ;;  %103 = vadd.xlane.f32.xlu1 %v102_v4  ;;  %v99_v6 = vsel %vm95_vm0, %v90_v2, 0.0  ;;  %v105_v7 = vsel %vm95_vm0, %v92_v5, 0.0  ;;  %v176_v28 = vld [vmem:[%s4263_s1 + $0x38] sm:$0xff]  ;;  %v280_v31 = vld [vmem:[%s4264_s2 + $0x30] sm:$0xff]  ;;  %v174_v32 = vld [vmem:[%s4263_s1 + $0x28] sm:$0xff]  ;;  %s3632_s4 = smov 80  }
  0x28   :  { %3151 = vmatprep.subr.mxu0 %v176_v28  ;;  %v281_v29 = vld [vmem:[%s4264_s2 + $0x38] sm:$0xff]  ;;  %v279_v33 = vld [vmem:[%s4264_s2 + $0x28] sm:$0xff]  ;;  %v173_v34 = vld [vmem:[%s4263_s1 + $0x20] sm:$0xff]  ;;  %s3634_s20 = smov [#allocation8]  }
  0x29   :  { %3152 = vmatpush3.msra.mxu0 %v176_v28  ;;  %3173 = vmatprep.subr.mxu1 %v281_v29  ;;  %v278_v35 = vld [vmem:[%s4264_s2 + $0x20] sm:$0xff]  ;;  %v172_v36 = vld [vmem:[%s4263_s1 + $0x18] sm:$0xff]  ;;  %v171_v38 = vld [vmem:[%s4263_s1 + $0x10] sm:$0xff]  ;;  %s2895_s21 = sshll.u32 %s3634_s20, 4  ;;  %s2896_s21 = int_to_ptr.vmem [resolvable:$true] %s2895_s21 }
  0x2a   :  { %3153 = vmatprep.subr.mxu0 %v175_v30  ;;  %3174 = vmatpush3.msra.mxu1 %v281_v29  ;;  %v277_v37 = vld [vmem:[%s4264_s2 + $0x18] sm:$0xff]  ;;  %v276_v39 = vld [vmem:[%s4264_s2 + $0x10] sm:$0xff]  ;;  %v170_v40 = vld [vmem:[%s4263_s1 + $0x8] sm:$0xff]  ;;  %p3604_p2 = scmp.lt.s32.totalorder %s2896_s21, %s2896_s21 }
  0x2b   :  { %100 = vadd.xlane.f32.xlu0 %v99_v6  ;;  %106 = vadd.xlane.f32.xlu1 %v105_v7  ;;  %v275_v41 = vld [vmem:[%s4264_s2 + $0x8] sm:$0xff]  ;;  %v169_v42 = vld [vmem:[%s4263_s1] sm:$0xff]  ;;  %v374_v44 = vld [vmem:[%s4265_s3 + $0x38] sm:$0xff] }
  0x2c   :  { %3154 = vmatpush3.msra.mxu0 %v175_v30  ;;  %3175 = vmatprep.subr.mxu1 %v280_v31  ;;  %v274_v43 = vld [vmem:[%s4264_s2] sm:$0xff] }
  0x2d   :  { %3155 = vmatprep.subr.mxu0 %v174_v32  ;;  %3176 = vmatpush3.msra.mxu1 %v280_v31  ;;  %v2908_v58 = vld [vmem:[%s4272_s10] ss:$0 sm:$0xff] }
  0x2e   :  { %3156 = vmatpush3.msra.mxu0 %v174_v32  ;;  %3177 = vmatprep.subr.mxu1 %v279_v33  ;;  %v2909_v60 = vld [vmem:[%s4273_s11] ss:$0 sm:$0xff] }
  0x2f   :  { %3157 = vmatprep.subr.mxu0 %v173_v34  ;;  %3178 = vmatpush3.msra.mxu1 %v279_v33 }
  0x30   :  { %3158 = vmatpush3.msra.mxu0 %v173_v34  ;;  %3179 = vmatprep.subr.mxu1 %v278_v35 }
  0x31   :  { %3159 = vmatprep.subr.mxu0 %v172_v36  ;;  %3180 = vmatpush3.msra.mxu1 %v278_v35 }
  0x32   :  { %3160 = vmatpush3.msra.mxu0 %v172_v36  ;;  %3181 = vmatprep.subr.mxu1 %v277_v37 }
  0x33   :  { %3161 = vmatprep.subr.mxu0 %v171_v38  ;;  %3182 = vmatpush3.msra.mxu1 %v277_v37 }
  0x34   :  { %3162 = vmatpush3.msra.mxu0 %v171_v38  ;;  %3183 = vmatprep.subr.mxu1 %v276_v39 }
  0x35   :  { %3163 = vmatprep.subr.mxu0 %v170_v40  ;;  %3184 = vmatpush3.msra.mxu1 %v276_v39 }
  0x36   :  { %3164 = vmatpush3.msra.mxu0 %v170_v40  ;;  %3185 = vmatprep.subr.mxu1 %v275_v41 }
  0x37   :  { %3165 = vmatprep.subr.mxu0 %v169_v42  ;;  %3186 = vmatpush3.msra.mxu1 %v275_v41 }
  0x38   :  { %3166 = vmatpush3.msra.mxu0 %v169_v42  ;;  %3187 = vmatprep.subr.mxu1 %v274_v43 }
  0x39   :  { %3188 = vmatpush3.msra.mxu1 %v274_v43  ;;  %3195 = vmatprep.subr.mxu0 %v374_v44 }
  0xb0   :  { %v98_v8 = vpop.xlane.xlu0 %97  ;;  %v104_v9 = vpop.xlane.xlu1 %103 }
  0xb1   :  { %v109_v10 = vmul.f32 0.015625, %v98_v8  ;;  %v111_v11 = vmul.f32 0.015625, %v104_v9  ;;  %v373_v9 = vld [vmem:[%s4265_s3 + $0x30] sm:$0xff] }
  0xb3   :  { %v3732_v12 = vsub.f32 %v89_v0, %v109_v10  ;;  %v3734_v13 = vsub.f32 %v91_v1, %v111_v11  ;;  %v372_v11 = vld [vmem:[%s4265_s3 + $0x28] sm:$0xff] }
  0xb4   :  { %v101_v14 = vpop.xlane.xlu0 %100  ;;  %v107_v15 = vpop.xlane.xlu1 %106 }
  0xb5   :  { %v110_v16 = vmul.f32 0.015625, %v101_v14  ;;  %v112_v17 = vmul.f32 0.015625, %v107_v15  ;;  %v117_v18 = vmul.f32 %v3732_v12, %v3732_v12  ;;  %v119_v19 = vmul.f32 %v3734_v13, %v3734_v13  ;;  %v370_v14 = vld [vmem:[%s4265_s3 + $0x18] sm:$0xff]  ;;  %v369_v15 = vld [vmem:[%s4265_s3 + $0x10] sm:$0xff] }
  0xb7   :  { %v3740_v20 = vsub.f32 %v90_v2, %v110_v16  ;;  %v3742_v21 = vsub.f32 %v92_v5, %v112_v17  ;;  %v121_v22 = vsel %vm95_vm0, %v117_v18, 0.0  ;;  %v127_v23 = vsel %vm95_vm0, %v119_v19, 0.0  ;;  %v368_v16 = vld [vmem:[%s4265_s3 + $0x8] sm:$0xff]  ;;  %v367_v17 = vld [vmem:[%s4265_s3] sm:$0xff] }
  0xb8   :  { %122 = vadd.xlane.f32.xlu0 %v121_v22 }
  0xb9   :  { %v118_v24 = vmul.f32 %v3740_v20, %v3740_v20  ;;  %v120_v25 = vmul.f32 %v3742_v21, %v3742_v21 }
  0xbb   :  { %v124_v26 = vsel %vm95_vm0, %v118_v24, 0.0  ;;  %v130_v27 = vsel %vm95_vm0, %v120_v25, 0.0 }
  0xbc   :  { %128 = vadd.xlane.f32.xlu0 %v127_v23  ;;  %125 = vadd.xlane.f32.xlu1 %v124_v26 }
  0xc0   :  { %131 = vadd.xlane.f32.xlu1 %v130_v27 }
 0x141   :  { %v123_v45 = vpop.xlane.xlu0 %122 }
 0x142   :  { %v133_v46 = vmul.f32 0.015625, %v123_v45 }
 0x144   :  { %v137_v47 = vadd.f32 1e-05, %v133_v46 }
 0x145   :  { %v126_v48 = vpop.xlane.xlu1 %125  ;;  %v129_v49 = vpop.xlane.xlu0 %128 }
 0x146   :  { %3439 = vrsqrt.f32 %v137_v47  ;;  %v134_v50 = vmul.f32 0.015625, %v126_v48  ;;  %v135_v51 = vmul.f32 0.015625, %v129_v49 }
 0x148   :  { %v138_v52 = vadd.f32 1e-05, %v134_v50  ;;  %v139_v53 = vadd.f32 1e-05, %v135_v51 }
 0x149   :  { %v132_v54 = vpop.xlane.xlu1 %131 }
 0x14a   :  { %3441 = vrsqrt.f32 %v138_v52  ;;  %v136_v55 = vmul.f32 0.015625, %v132_v54 }
 0x14b   :  { %3443 = vrsqrt.f32 %v139_v53 }
 0x14c   :  { %v140_v56 = vadd.f32 1e-05, %v136_v55 }
 0x14e   :  { %3445 = vrsqrt.f32 %v140_v56 }
 0x153   :  { %v3440_v57 = vpop.eup %3439 }
 0x154   :  { %v145_v59 = vmul.f32 %v3440_v57, %v3732_v12 }
 0x156   :  { %v155_v61 = vmul.f32 %v2908_v58, %v145_v59 }
 0x157   :  { %v3442_v62 = vpop.eup %3441 }
 0x158   :  { %v3444_v63 = vpop.eup %3443  ;;  %v165_v0 = vadd.f32 %v2909_v60, %v155_v61  ;;  %v146_v1 = vmul.f32 %v3442_v62, %v3740_v20 }
 0x159   :  { %v147_v2 = vmul.f32 %v3444_v63, %v3734_v13  ;;  %v371_v13 = vld [vmem:[%s4265_s3 + $0x20] sm:$0xff]  ;;  %s3630_s3 = smov 112  }
 0x15a   :  { %3167 = vmatprep.mubr.msk.f32.mxu0 %vm95_vm0, %v165_v0  ;;  %3189 = vmatprep.mubr.msk.f32.mxu1 %vm95_vm0, %v165_v0  ;;  %v156_v3 = vmul.f32 %v2908_v58, %v146_v1 }
 0x15b   :  { %v3446_v4 = vpop.eup %3445  ;;  %v157_v5 = vmul.f32 %v2908_v58, %v147_v2 }
 0x15c   :  { %v166_v6 = vadd.f32 %v2909_v60, %v156_v3  ;;  %v148_v7 = vmul.f32 %v3446_v4, %v3742_v21 }
 0x15d   :  { %v167_v8 = vadd.f32 %v2909_v60, %v157_v5 }
 0x15e   :  { %3168 = vmatmul.mubr.msk.f32.vlgmr.msra.gmra.mxu0 %vm95_vm0, %v166_v6  ;;  %3190 = vmatmul.mubr.msk.f32.vlgmr.msra.gmra.mxu1 %vm95_vm0, %v166_v6  ;;  %v158_v10 = vmul.f32 %v2908_v58, %v148_v7 }
 0x15f   :  { %3196 = vmatpush3.msra.mxu0 %v374_v44  ;;  %3170 = vmatprep.mubr.msk.f32.mxu0 %vm95_vm0, %v167_v8 }
 0x160   :  { %3192 = vmatprep.mubr.msk.f32.mxu1 %vm95_vm0, %v167_v8  ;;  %3197 = vmatprep.subr.mxu0 %v373_v9  ;;  %v168_v12 = vadd.f32 %v2909_v60, %v158_v10 }
 0x161   :  { %3198 = vmatpush3.msra.mxu0 %v373_v9 }
 0x162   :  { %3199 = vmatprep.subr.mxu0 %v372_v11  ;;  %3171 = vmatmul.mubr.msk.f32.gmra.mxu0 %vm95_vm0, %v168_v12 }
 0x163   :  { %3193 = vmatmul.mubr.msk.f32.gmra.mxu1 %vm95_vm0, %v168_v12  ;;  %3200 = vmatpush3.msra.mxu0 %v372_v11 }
 0x164   :  { %3201 = vmatprep.subr.mxu0 %v371_v13  ;;  %3211 = vmatprep.mubr.msk.f32.mxu0 %vm95_vm0, %v165_v0 }
 0x165   :  { %3202 = vmatpush3.msra.mxu0 %v371_v13 }
 0x166   :  { %3203 = vmatprep.subr.mxu0 %v370_v14 }
 0x167   :  { %3204 = vmatpush3.msra.mxu0 %v370_v14 }
 0x168   :  { %3205 = vmatprep.subr.mxu0 %v369_v15 }
 0x169   :  { %3206 = vmatpush3.msra.mxu0 %v369_v15 }
 0x16a   :  { %3207 = vmatprep.subr.mxu0 %v368_v16 }
 0x16b   :  { %3208 = vmatpush3.msra.mxu0 %v368_v16 }
 0x16c   :  { %3209 = vmatprep.subr.mxu0 %v367_v17 }
 0x16d   :  { %3210 = vmatpush3.msra.mxu0 %v367_v17 }
 0x16e   :  { %3212 = vmatmul.mubr.msk.f32.vlgmr.msra.gmra.mxu0 %vm95_vm0, %v166_v6 }
 0x16f   :  { %3214 = vmatprep.mubr.msk.f32.mxu0 %vm95_vm0, %v167_v8 }
 0x172   :  { %3215 = vmatmul.mubr.msk.f32.gmra.mxu0 %vm95_vm0, %v168_v12 }
 0x21e   :  { %v3846_v18 = vpop.f32.mrf.mxu0  ;;  %v3848_v19 = vpop.f32.mrf.mxu1 }
 0x21f   :  { %3217 = vmatprep.subr.msk.mxu1 %vm468_vm1, %v3848_v19 }
 0x220   :  { %v3852_v20 = vpop.f32.mrf.mxu0  ;;  %v3854_v21 = vpop.f32.mrf.mxu1  ;;  %3218 = vmatpush3.xpose.msk.msra.mxu1 %vm468_vm1, %v3848_v19 }
 0x221   :  { %3219 = vmatprep.subr.msk.mxu1 %vm468_vm1, %v3854_v21  ;;  %3221 = vmatprep.mubr.msk.f32.mxu1 %vm468_vm1, %v3852_v20 }
 0x222   :  { %v3862_v22 = vpop.f32.mrf.mxu0 }
 0x223   :  { %v3864_v23 = vpop.f32.mrf.mxu1 }
 0x224   :  { %3220 = vmatpush3.xpose.msk.msra.mxu1 %vm468_vm1, %v3854_v21  ;;  %v3870_v24 = vpop.f32.mrf.mxu0 }
 0x225   :  { %3224 = vmatprep.subr.msk.mxu1 %vm468_vm1, %v3864_v23  ;;  %v3874_v25 = vpop.f32.mrf.mxu1 }
 0x227   :  { %3222 = vmatmul.mubr.msk.f32.vlgmr.msra.gmra.mxu1 %vm468_vm1, %v3846_v18 }
 0x228   :  { %3225 = vmatpush3.xpose.msk.msra.mxu1 %vm468_vm1, %v3864_v23  ;;  %3228 = vmatprep.mubr.msk.f32.mxu1 %vm468_vm1, %v3870_v24 }
 0x229   :  { %3226 = vmatprep.subr.msk.mxu1 %vm468_vm1, %v3874_v25 }
 0x22c   :  { %3227 = vmatpush3.xpose.msk.msra.mxu1 %vm468_vm1, %v3874_v25 }
 0x22e   :  { %v3884_v26 = vpop.f32.mrf.mxu0 }
 0x22f   :  { %3231 = vmatprep.subr.mxu1 %v3884_v26  ;;  %3229 = vmatmul.mubr.msk.f32.vlgmr.msra.gmra.mxu1 %vm468_vm1, %v3862_v22 }
 0x230   :  { %v3889_v27 = vpop.f32.mrf.mxu0  ;;  %3232 = vmatpush3.msra.mxu1 %v3884_v26 }
 0x231   :  { %3233 = vmatprep.subr.mxu1 %v3889_v27 }
 0x232   :  { %v3893_v28 = vpop.f32.mrf.mxu0  ;;  %3234 = vmatpush3.msra.mxu1 %v3889_v27 }
 0x233   :  { %3238 = vmatprep.subr.mxu1 %v3893_v28 }
 0x234   :  { %v3925_v10 = vpop.f32.mrf.mxu0 }
 0x2e7   :  { %v3223_v29 = vpop.f32.mrf.mxu1 }
 0x2e8   :  { %v644_v30 = vmul.f32 0.25, %v3223_v29  ;;  %v461_v29 = vld [vmem:[#allocation5 + $0x8] sm:$0xff] }
 0x2e9   :  { %v547_v31 = vpop.f32.mrf.mxu1 }
 0x2ea   :  { %v643_v32 = vmul.f32 0.25, %v547_v31  ;;  %v650_v33 = vsel %vm468_vm1, %v644_v30, -inf }
 0x2eb   :  { %651 = vmax.xlane.f32.xlu1 %v650_v33 }
 0x2ec   :  { %v647_v34 = vsel %vm468_vm1, %v643_v32, -inf }
 0x2ed   :  { %648 = vmax.xlane.f32.xlu0 %v647_v34 }
 0x2ef   :  { %v3230_v35 = vpop.f32.mrf.mxu1 }
 0x2f0   :  { %v646_v36 = vmul.f32 0.25, %v3230_v35 }
 0x2f1   :  { %v634_v37 = vpop.f32.mrf.mxu1 }
 0x2f2   :  { %v645_v38 = vmul.f32 0.25, %v634_v37  ;;  %v656_v39 = vsel %vm468_vm1, %v646_v36, -inf }
 0x2f3   :  { %657 = vmax.xlane.f32.xlu1 %v656_v39 }
 0x2f4   :  { %v653_v40 = vsel %vm468_vm1, %v645_v38, -inf }
 0x2f5   :  { %654 = vmax.xlane.f32.xlu0 %v653_v40 }
 0x374   :  { %v652_v41 = vpop.xlane.xlu1 %651 }
 0x375   :  { %v660_v42 = vsub.f32 %v644_v30, %v652_v41  ;;  %v460_v30 = vld [vmem:[#allocation5] sm:$0xff] }
 0x376   :  { %v649_v43 = vpop.xlane.xlu0 %648 }
 0x377   :  { %v665_v44 = vmul.f32 1.442695, %v660_v42  ;;  %v659_v45 = vsub.f32 %v643_v32, %v649_v43 }
 0x379   :  { %3447 = vpow2.f32 %v665_v44  ;;  %v663_v46 = vmul.f32 1.442695, %v659_v45 }
 0x37b   :  { %3449 = vpow2.f32 %v663_v46 }
 0x37c   :  { %v658_v47 = vpop.xlane.xlu1 %657 }
 0x37d   :  { %v662_v48 = vsub.f32 %v646_v36, %v658_v47 }
 0x37e   :  { %v655_v49 = vpop.xlane.xlu0 %654 }
 0x37f   :  { %v669_v50 = vmul.f32 1.442695, %v662_v48  ;;  %v661_v51 = vsub.f32 %v645_v38, %v655_v49 }
 0x381   :  { %3451 = vpow2.f32 %v669_v50  ;;  %v667_v52 = vmul.f32 1.442695, %v661_v51 }
 0x383   :  { %3453 = vpow2.f32 %v667_v52 }
 0x386   :  { %v3448_v53 = vpop.eup %3447 }
 0x387   :  { %v674_v54 = vsel %vm468_vm1, %v3448_v53, 0.0 }
 0x388   :  { %v3450_v55 = vpop.eup %3449  ;;  %675 = vadd.xlane.f32.xlu1 %v674_v54 }
 0x389   :  { %v671_v56 = vsel %vm468_vm1, %v3450_v55, 0.0 }
 0x38a   :  { %672 = vadd.xlane.f32.xlu0 %v671_v56 }
 0x38e   :  { %v3452_v57 = vpop.eup %3451 }
 0x38f   :  { %v680_v58 = vsel %vm468_vm1, %v3452_v57, 0.0 }
 0x390   :  { %v3454_v59 = vpop.eup %3453  ;;  %681 = vadd.xlane.f32.xlu1 %v680_v58 }
 0x391   :  { %v677_v60 = vsel %vm468_vm1, %v3454_v59, 0.0 }
 0x392   :  { %678 = vadd.xlane.f32.xlu0 %v677_v60 }
 0x3a1   :  { %857 = vrot.lane.b32.xlu1 %v3854_v21, %s3630_s3 }
 0x3a5   :  { %950 = vrot.lane.b32.xlu1 %v3864_v23, %s3630_s3 }
 0x3a8   :  { %859 = vrot.lane.b32.xlu0 %v3848_v19, %s3630_s3 }
 0x3a9   :  { %853 = vrot.lane.b32.xlu1 %v3852_v20, %s3630_s3 }
 0x3ac   :  { %855 = vrot.lane.b32.xlu0 %v3846_v18, %s3630_s3 }
 0x3ad   :  { %948 = vrot.lane.b32.xlu1 %v3874_v25, %s3630_s3 }
 0x3b0   :  { %944 = vrot.lane.b32.xlu0 %v3870_v24, %s3630_s3 }
 0x3b1   :  { %946 = vrot.lane.b32.xlu1 %v3862_v22, %s3630_s3 }
 0x411   :  { %v676_v61 = vpop.xlane.xlu1 %675 }
 0x412   :  { %3455 = vrcp.f32 %v676_v61 }
 0x413   :  { %v673_v62 = vpop.xlane.xlu0 %672 }
 0x414   :  { %3457 = vrcp.f32 %v673_v62 }
 0x419   :  { %v682_v63 = vpop.xlane.xlu1 %681 }
 0x41a   :  { %3459 = vrcp.f32 %v682_v63 }
 0x41b   :  { %v679_v0 = vpop.xlane.xlu0 %678 }
 0x41c   :  { %3461 = vrcp.f32 %v679_v0 }
 0x41d   :  { %v858_v1 = vpop.permute.xlu1 %857 }
 0x41f   :  { %v860_v2 = vpop.permute.xlu0 %859  ;;  %v3456_v3 = vpop.eup %3455 }
 0x420   :  { %v688_v8 = vmul.f32 %v3456_v3, %v3448_v53 }
 0x421   :  { %v3458_v4 = vpop.eup %3457  ;;  %v951_v5 = vpop.permute.xlu1 %950 }
 0x422   :  { %3252 = vmatprep.subr.msk.mxu0 %vm468_vm1, %v951_v5  ;;  %v687_v6 = vmul.f32 %v3458_v4, %v3450_v55 }
 0x423   :  { %3253 = vmatpush3.xpose.msk.msra.mxu0 %vm468_vm1, %v951_v5  ;;  %v856_v7 = vpop.permute.xlu0 %855 }
 0x424   :  { %3235 = vmatprep.mubr.msk.f32.mxu1 %vm468_vm1, %v687_v6 }
 0x425   :  { %v854_v9 = vpop.permute.xlu1 %853  ;;  %3236 = vmatmul.mubr.msk.f32.vlgmr.msra.gmra.mxu1 %vm468_vm1, %v688_v8 }
 0x426   :  { %3239 = vmatpush3.msra.mxu1 %v3893_v28 }
 0x427   :  { %3240 = vmatprep.subr.mxu1 %v3925_v10  ;;  %v945_v11 = vpop.permute.xlu0 %944  ;;  %v3460_v12 = vpop.eup %3459 }
 0x428   :  { %3241 = vmatpush3.msra.mxu1 %v3925_v10  ;;  %3256 = vmatprep.mubr.msk.f32.mxu0 %vm468_vm1, %v945_v11  ;;  %v690_v16 = vmul.f32 %v3460_v12, %v3452_v57 }
 0x429   :  { %v3462_v13 = vpop.eup %3461  ;;  %3245 = vmatprep.subr.msk.mxu1 %vm468_vm1, %v860_v2  ;;  %v949_v14 = vpop.permute.xlu1 %948 }
 0x42a   :  { %3254 = vmatprep.subr.msk.mxu0 %vm468_vm1, %v949_v14  ;;  %v689_v15 = vmul.f32 %v3462_v13, %v3454_v59 }
 0x42b   :  { %3255 = vmatpush3.xpose.msk.msra.mxu0 %vm468_vm1, %v949_v14 }
 0x42c   :  { %3242 = vmatprep.mubr.msk.f32.mxu1 %vm468_vm1, %v689_v15  ;;  %3283 = vmatprep.subr.mxu0 %v461_v29 }
 0x42d   :  { %v947_v17 = vpop.permute.xlu1 %946  ;;  %3243 = vmatmul.mubr.msk.f32.vlgmr.msra.gmra.mxu1 %vm468_vm1, %v690_v16 }
 0x42e   :  { %3246 = vmatpush3.xpose.msk.msra.mxu1 %vm468_vm1, %v860_v2  ;;  %3249 = vmatprep.mubr.msk.f32.mxu1 %vm468_vm1, %v854_v9 }
 0x42f   :  { %3247 = vmatprep.subr.msk.mxu1 %vm468_vm1, %v858_v1  ;;  %3257 = vmatmul.mubr.msk.f32.vlgmr.msra.gmra.mxu0 %vm468_vm1, %v947_v17 }
 0x430   :  { %3284 = vmatpush3.msra.mxu0 %v461_v29 }
 0x431   :  { %3285 = vmatprep.subr.mxu0 %v460_v30 }
 0x432   :  { %3248 = vmatpush3.xpose.msk.msra.mxu1 %vm468_vm1, %v858_v1  ;;  %3286 = vmatpush3.msra.mxu0 %v460_v30 }
 0x435   :  { %3250 = vmatmul.mubr.msk.f32.vlgmr.msra.gmra.mxu1 %vm468_vm1, %v856_v7 }
 0x4e5   :  { %v3237_v31 = vpop.f32.mrf.mxu1 }
 0x4e7   :  { %v763_v32 = vpop.f32.mrf.mxu1 }
 0x4e8   :  { %3287 = vmatprep.mubr.msk.f32.mxu0 %vm468_vm1, %v763_v32 }
 0x4e9   :  { %3288 = vmatmul.mubr.msk.f32.vlgmr.msra.gmra.mxu0 %vm468_vm1, %v3237_v31 }
 0x4ed   :  { %v3244_v33 = vpop.f32.mrf.mxu1 }
 0x4ef   :  { %v844_v34 = vpop.f32.mrf.mxu1  ;;  %v3258_v35 = vpop.f32.mrf.mxu0 }
 0x4f0   :  { %3290 = vmatprep.mubr.msk.f32.mxu0 %vm468_vm1, %v844_v34  ;;  %v1038_v44 = vmul.f32 0.25, %v3258_v35  ;;  %v463_v35 = vld [vmem:[#allocation5 + $0x18] sm:$0xff] }
 0x4f1   :  { %3291 = vmatmul.mubr.msk.f32.gmra.mxu0 %vm468_vm1, %v3244_v33  ;;  %v1026_v38 = vpop.f32.mrf.mxu0 }
 0x4f2   :  { %v1037_v42 = vmul.f32 0.25, %v1026_v38  ;;  %v1048_v46 = vsel %vm468_vm1, %v1038_v44, -inf  ;;  %v462_v38 = vld [vmem:[#allocation5 + $0x10] sm:$0xff] }
 0x4f4   :  { %v1045_v45 = vsel %vm468_vm1, %v1037_v42, -inf }
 0x4f5   :  { %v3251_v36 = vpop.f32.mrf.mxu1 }
 0x4f6   :  { %v1036_v37 = vmul.f32 0.25, %v3251_v36 }
 0x4f7   :  { %v935_v39 = vpop.f32.mrf.mxu1 }
 0x4f8   :  { %v1035_v40 = vmul.f32 0.25, %v935_v39  ;;  %v1042_v41 = vsel %vm468_vm1, %v1036_v37, -inf }
 0x4f9   :  { %1043 = vmax.xlane.f32.xlu1 %v1042_v41 }
 0x4fa   :  { %v1039_v43 = vsel %vm468_vm1, %v1035_v40, -inf }
 0x4fb   :  { %1040 = vmax.xlane.f32.xlu0 %v1039_v43 }
 0x4ff   :  { %1046 = vmax.xlane.f32.xlu0 %v1045_v45 }
 0x503   :  { %1049 = vmax.xlane.f32.xlu0 %v1048_v46 }
 0x582   :  { %v1044_v49 = vpop.xlane.xlu1 %1043 }
 0x583   :  { %v1052_v52 = vsub.f32 %v1036_v37, %v1044_v49 }
 0x584   :  { %v1041_v47 = vpop.xlane.xlu0 %1040 }
 0x585   :  { %v1051_v48 = vsub.f32 %v1035_v40, %v1041_v47  ;;  %v1057_v57 = vmul.f32 1.442695, %v1052_v52 }
 0x587   :  { %v1055_v53 = vmul.f32 1.442695, %v1051_v48 }
 0x588   :  { %v1047_v50 = vpop.xlane.xlu0 %1046 }
 0x589   :  { %v1053_v51 = vsub.f32 %v1037_v42, %v1047_v50 }
 0x58b   :  { %v1059_v54 = vmul.f32 1.442695, %v1053_v51 }
 0x58c   :  { %v1050_v55 = vpop.xlane.xlu0 %1049 }
 0x58d   :  { %3463 = vpow2.f32 %v1059_v54  ;;  %v1054_v56 = vsub.f32 %v1038_v44, %v1050_v55 }
 0x58e   :  { %3465 = vpow2.f32 %v1055_v53 }
 0x58f   :  { %v1061_v58 = vmul.f32 1.442695, %v1054_v56 }
 0x591   :  { %3467 = vpow2.f32 %v1061_v58 }
 0x592   :  { %3469 = vpow2.f32 %v1057_v57 }
 0x59a   :  { %v3464_v59 = vpop.eup %3463 }
 0x59b   :  { %v1069_v60 = vsel %vm468_vm1, %v3464_v59, 0.0  ;;  %v3466_v61 = vpop.eup %3465 }
 0x59c   :  { %1070 = vadd.xlane.f32.xlu0 %v1069_v60  ;;  %v1063_v63 = vsel %vm468_vm1, %v3466_v61, 0.0 }
 0x59e   :  { %v3468_v62 = vpop.eup %3467 }
 0x59f   :  { %v1072_v0 = vsel %vm468_vm1, %v3468_v62, 0.0  ;;  %v3470_v1 = vpop.eup %3469 }
 0x5a0   :  { %1064 = vadd.xlane.f32.xlu0 %v1063_v63  ;;  %1073 = vadd.xlane.f32.xlu1 %v1072_v0  ;;  %v1066_v2 = vsel %vm468_vm1, %v3470_v1, 0.0 }
 0x5a4   :  { %1067 = vadd.xlane.f32.xlu1 %v1066_v2 }
 0x5a9   :  { %v3998_v45 = vpop.f32.mrf.mxu0 }
 0x5ab   :  { %v4000_v46 = vpop.f32.mrf.mxu0 }
 0x5b1   :  { %v4002_v47 = vpop.f32.mrf.mxu0 }
 0x5b3   :  { %v4008_v50 = vpop.f32.mrf.mxu0 }
 0x5b5   :  { %1085 = vrot.lane.b32.xlu1 %v3889_v27, %s3630_s3 }
 0x5b6   :  { %1087 = vrot.lane.b32.xlu0 %v3884_v26, %s3630_s3 }
 0x5b9   :  { %1176 = vrot.lane.b32.xlu1 %v3893_v28, %s3630_s3 }
 0x5ba   :  { %1461 = vrot.lane.b32.xlu0 %v3848_v19, %s3631_s27 }
 0x5bd   :  { %1174 = vrot.lane.b32.xlu1 %v3925_v10, %s3630_s3 }
 0x5be   :  { %1552 = vrot.lane.b32.xlu0 %v3864_v23, %s3631_s27 }
 0x5c1   :  { %1459 = vrot.lane.b32.xlu1 %v3854_v21, %s3631_s27 }
 0x5c2   :  { %1457 = vrot.lane.b32.xlu0 %v3846_v18, %s3631_s27 }
 0x5c5   :  { %1455 = vrot.lane.b32.xlu1 %v3852_v20, %s3631_s27 }
 0x5c6   :  { %1546 = vrot.lane.b32.xlu0 %v3870_v24, %s3631_s27 }
 0x5c9   :  { %1550 = vrot.lane.b32.xlu1 %v3874_v25, %s3631_s27 }
 0x5cd   :  { %1548 = vrot.lane.b32.xlu1 %v3862_v22, %s3631_s27 }
 0x625   :  { %v1071_v3 = vpop.xlane.xlu0 %1070 }
 0x629   :  { %v1074_v4 = vpop.xlane.xlu1 %1073  ;;  %v1065_v5 = vpop.xlane.xlu0 %1064 }
 0x62a   :  { %3471 = vrcp.f32 %v1065_v5 }
 0x62b   :  { %3473 = vrcp.f32 %v1071_v3 }
 0x62d   :  { %v1068_v6 = vpop.xlane.xlu1 %1067  ;;  %v1088_v7 = vpop.permute.xlu0 %1087 }
 0x62e   :  { %3475 = vrcp.f32 %v1068_v6  ;;  %3259 = vmatprep.subr.mxu1 %v1088_v7 }
 0x62f   :  { %3260 = vmatpush3.msra.mxu1 %v1088_v7  ;;  %3477 = vrcp.f32 %v1074_v4 }
 0x631   :  { %v1086_v8 = vpop.permute.xlu1 %1085  ;;  %v1462_v9 = vpop.permute.xlu0 %1461 }
 0x632   :  { %3261 = vmatprep.subr.mxu1 %v1086_v8 }
 0x633   :  { %3262 = vmatpush3.msra.mxu1 %v1086_v8 }
 0x635   :  { %v1177_v11 = vpop.permute.xlu1 %1176  ;;  %v1553_v12 = vpop.permute.xlu0 %1552 }
 0x636   :  { %3266 = vmatprep.subr.mxu1 %v1177_v11  ;;  %3300 = vmatprep.subr.msk.mxu0 %vm468_vm1, %v1553_v12 }
 0x637   :  { %3301 = vmatpush3.xpose.msk.msra.mxu0 %vm468_vm1, %v1553_v12  ;;  %v3472_v13 = vpop.eup %3471 }
 0x638   :  { %v1079_v16 = vmul.f32 %v3472_v13, %v3466_v61  ;;  %v3474_v17 = vpop.eup %3473 }
 0x639   :  { %v1175_v14 = vpop.permute.xlu1 %1174  ;;  %v1458_v15 = vpop.permute.xlu0 %1457  ;;  %v1081_v34 = vmul.f32 %v3474_v17, %v3464_v59 }
 0x63a   :  { %3263 = vmatprep.mubr.msk.f32.mxu1 %vm468_vm1, %v1079_v16 }
 0x63b   :  { %v3476_v29 = vpop.eup %3475 }
 0x63c   :  { %v1080_v30 = vmul.f32 %v3476_v29, %v3470_v1  ;;  %v3478_v31 = vpop.eup %3477 }
 0x63d   :  { %v1460_v32 = vpop.permute.xlu1 %1459  ;;  %v1547_v33 = vpop.permute.xlu0 %1546  ;;  %v1082_v36 = vmul.f32 %v3478_v31, %v3468_v62 }
 0x63e   :  { %3264 = vmatmul.mubr.msk.f32.vlgmr.msra.gmra.mxu1 %vm468_vm1, %v1080_v30  ;;  %3304 = vmatprep.mubr.msk.f32.mxu0 %vm468_vm1, %v1547_v33 }
 0x63f   :  { %3267 = vmatpush3.msra.mxu1 %v1177_v11  ;;  %3270 = vmatprep.mubr.msk.f32.mxu1 %vm468_vm1, %v1081_v34  ;;  %v465_v34 = vld [vmem:[#allocation5 + $0x28] sm:$0xff] }
 0x640   :  { %3268 = vmatprep.subr.mxu1 %v1175_v14 }
 0x641   :  { %3269 = vmatpush3.msra.mxu1 %v1175_v14  ;;  %v1456_v37 = vpop.permute.xlu1 %1455 }
 0x642   :  { %3273 = vmatprep.subr.mxu1 %v463_v35  ;;  %3271 = vmatmul.mubr.msk.f32.vlgmr.msra.gmra.mxu1 %vm468_vm1, %v1082_v36 }
 0x643   :  { %3274 = vmatpush3.msra.mxu1 %v463_v35 }
 0x644   :  { %3275 = vmatprep.subr.mxu1 %v462_v38 }
 0x645   :  { %3276 = vmatpush3.msra.mxu1 %v462_v38  ;;  %v1551_v39 = vpop.permute.xlu1 %1550 }
 0x646   :  { %3293 = vmatprep.subr.msk.mxu1 %vm468_vm1, %v1462_v9  ;;  %3302 = vmatprep.subr.msk.mxu0 %vm468_vm1, %v1551_v39 }
 0x647   :  { %3303 = vmatpush3.xpose.msk.msra.mxu0 %vm468_vm1, %v1551_v39 }
 0x649   :  { %v1549_v40 = vpop.permute.xlu1 %1548 }
 0x64a   :  { %3305 = vmatmul.mubr.msk.f32.vlgmr.msra.gmra.mxu0 %vm468_vm1, %v1549_v40 }
 0x6fe   :  { %v3265_v41 = vpop.f32.mrf.mxu1 }
 0x700   :  { %v1163_v42 = vpop.f32.mrf.mxu1 }
 0x701   :  { %3277 = vmatprep.mubr.msk.f32.mxu1 %vm468_vm1, %v1163_v42 }
 0x702   :  { %v3272_v43 = vpop.f32.mrf.mxu1  ;;  %3278 = vmatmul.mubr.msk.f32.vlgmr.msra.gmra.mxu1 %vm468_vm1, %v3265_v41 }
 0x703   :  { %3294 = vmatpush3.xpose.msk.msra.mxu1 %vm468_vm1, %v1462_v9 }
 0x704   :  { %3295 = vmatprep.subr.msk.mxu1 %vm468_vm1, %v1460_v32  ;;  %v1252_v44 = vpop.f32.mrf.mxu1 }
 0x705   :  { %3280 = vmatprep.mubr.msk.f32.mxu1 %vm468_vm1, %v1252_v44 }
 0x706   :  { %3281 = vmatmul.mubr.msk.f32.gmra.mxu1 %vm468_vm1, %v3272_v43 }
 0x707   :  { %3296 = vmatpush3.xpose.msk.msra.mxu1 %vm468_vm1, %v1460_v32  ;;  %3297 = vmatprep.mubr.msk.f32.mxu1 %vm468_vm1, %v1456_v37 }
 0x70a   :  { %3298 = vmatmul.mubr.msk.f32.vlgmr.msra.gmra.mxu1 %vm468_vm1, %v1458_v15  ;;  %v3306_v52 = vpop.f32.mrf.mxu0 }
 0x70b   :  { %v1640_v62 = vmul.f32 0.25, %v3306_v52  ;;  %v464_v52 = vld [vmem:[#allocation5 + $0x20] sm:$0xff] }
 0x70c   :  { %v1628_v56 = vpop.f32.mrf.mxu0 }
 0x70d   :  { %v1639_v60 = vmul.f32 0.25, %v1628_v56  ;;  %v1650_v0 = vsel %vm468_vm1, %v1640_v62, -inf }
 0x70f   :  { %v1647_v63 = vsel %vm468_vm1, %v1639_v60, -inf }
 0x7c2   :  { %v4004_v48 = vpop.f32.mrf.mxu1 }
 0x7c4   :  { %v4006_v49 = vpop.f32.mrf.mxu1 }
 0x7c6   :  { %v4010_v51 = vpop.f32.mrf.mxu1 }
 0x7c8   :  { %v4012_v53 = vpop.f32.mrf.mxu1 }
 0x7ca   :  { %v3299_v54 = vpop.f32.mrf.mxu1 }
 0x7cb   :  { %v1638_v55 = vmul.f32 0.25, %v3299_v54 }
 0x7cc   :  { %v1537_v57 = vpop.f32.mrf.mxu1 }
 0x7cd   :  { %v1637_v58 = vmul.f32 0.25, %v1537_v57  ;;  %v1644_v59 = vsel %vm468_vm1, %v1638_v55, -inf }
 0x7ce   :  { %1645 = vmax.xlane.f32.xlu1 %v1644_v59 }
 0x7cf   :  { %v1641_v61 = vsel %vm468_vm1, %v1637_v58, -inf }
 0x7d0   :  { %1642 = vmax.xlane.f32.xlu0 %v1641_v61 }
 0x7d4   :  { %1648 = vmax.xlane.f32.xlu0 %v1647_v63 }
 0x7d8   :  { %1651 = vmax.xlane.f32.xlu0 %v1650_v0 }
 0x857   :  { %v1646_v3 = vpop.xlane.xlu1 %1645 }
 0x858   :  { %v1654_v6 = vsub.f32 %v1638_v55, %v1646_v3 }
 0x859   :  { %v1643_v1 = vpop.xlane.xlu0 %1642 }
 0x85a   :  { %v1653_v2 = vsub.f32 %v1637_v58, %v1643_v1  ;;  %v1659_v12 = vmul.f32 1.442695, %v1654_v6 }
 0x85c   :  { %v1657_v7 = vmul.f32 1.442695, %v1653_v2 }
 0x85d   :  { %v1649_v4 = vpop.xlane.xlu0 %1648 }
 0x85e   :  { %v1655_v5 = vsub.f32 %v1639_v60, %v1649_v4 }
 0x860   :  { %v1661_v8 = vmul.f32 1.442695, %v1655_v5 }
 0x861   :  { %v1652_v9 = vpop.xlane.xlu0 %1651 }
 0x862   :  { %3479 = vpow2.f32 %v1661_v8  ;;  %v1656_v11 = vsub.f32 %v1640_v62, %v1652_v9 }
 0x863   :  { %3481 = vpow2.f32 %v1657_v7 }
 0x864   :  { %v1663_v13 = vmul.f32 1.442695, %v1656_v11 }
 0x866   :  { %3483 = vpow2.f32 %v1663_v13  ;;  %v1442_v13 = vadd.f32 %v3998_v45, %v4004_v48 }
 0x867   :  { %3485 = vpow2.f32 %v1659_v12 }
 0x86f   :  { %v3480_v14 = vpop.eup %3479 }
 0x870   :  { %v1671_v15 = vsel %vm468_vm1, %v3480_v14, 0.0  ;;  %v3482_v16 = vpop.eup %3481 }
 0x871   :  { %1672 = vadd.xlane.f32.xlu0 %v1671_v15  ;;  %v1665_v29 = vsel %vm468_vm1, %v3482_v16, 0.0  ;;  %v1437_v15 = vadd.f32 %v4000_v46, %v4006_v49 }
 0x873   :  { %v3484_v17 = vpop.eup %3483 }
 0x874   :  { %v1674_v30 = vsel %vm468_vm1, %v3484_v17, 0.0  ;;  %v3486_v31 = vpop.eup %3485 }
 0x875   :  { %1666 = vadd.xlane.f32.xlu0 %v1665_v29  ;;  %1675 = vadd.xlane.f32.xlu1 %v1674_v30  ;;  %v1668_v32 = vsel %vm468_vm1, %v3486_v31, 0.0  ;;  %v1452_v30 = vadd.f32 %v4002_v47, %v4010_v51 }
 0x879   :  { %1669 = vadd.xlane.f32.xlu1 %v1668_v32 }
 0x88a   :  { %1685 = vrot.lane.b32.xlu1 %v3889_v27, %s3631_s27 }
 0x88b   :  { %1687 = vrot.lane.b32.xlu0 %v3884_v26, %s3631_s27 }
 0x88e   :  { %1774 = vrot.lane.b32.xlu1 %v3893_v28, %s3631_s27 }
 0x88f   :  { %1966 = vrot.lane.b32.xlu0 %v3848_v19, %s3632_s4 }
 0x892   :  { %1772 = vrot.lane.b32.xlu1 %v3925_v10, %s3631_s27 }
 0x893   :  { %2057 = vrot.lane.b32.xlu0 %v3864_v23, %s3632_s4 }
 0x896   :  { %1964 = vrot.lane.b32.xlu1 %v3854_v21, %s3632_s4 }
 0x897   :  { %1962 = vrot.lane.b32.xlu0 %v3846_v18, %s3632_s4 }
 0x89a   :  { %1960 = vrot.lane.b32.xlu1 %v3852_v20, %s3632_s4 }
 0x89b   :  { %2051 = vrot.lane.b32.xlu0 %v3870_v24, %s3632_s4 }
 0x89e   :  { %2055 = vrot.lane.b32.xlu1 %v3874_v25, %s3632_s4 }
 0x8a2   :  { %2053 = vrot.lane.b32.xlu1 %v3862_v22, %s3632_s4 }
 0x8fa   :  { %v1673_v19 = vpop.xlane.xlu0 %1672 }
 0x8fb   :  { %3487 = vrcp.f32 %v1673_v19  ;;  %v1447_v19 = vadd.f32 %v4008_v50, %v4012_v53 }
 0x8fe   :  { %v1676_v23 = vpop.xlane.xlu1 %1675  ;;  %v1667_v33 = vpop.xlane.xlu0 %1666 }
 0x8ff   :  { %3489 = vrcp.f32 %v1676_v23 }
 0x900   :  { %3491 = vrcp.f32 %v1667_v33 }
 0x902   :  { %v1670_v21 = vpop.xlane.xlu1 %1669  ;;  %v1688_v18 = vpop.permute.xlu0 %1687 }
 0x903   :  { %3493 = vrcp.f32 %v1670_v21  ;;  %3307 = vmatprep.subr.mxu1 %v1688_v18 }
 0x904   :  { %3308 = vmatpush3.msra.mxu1 %v1688_v18 }
 0x906   :  { %v1686_v20 = vpop.permute.xlu1 %1685  ;;  %v1967_v36 = vpop.permute.xlu0 %1966 }
 0x907   :  { %3309 = vmatprep.subr.mxu1 %v1686_v20 }
 0x908   :  { %v3488_v24 = vpop.eup %3487  ;;  %3310 = vmatpush3.msra.mxu1 %v1686_v20 }
 0x909   :  { %v1683_v25 = vmul.f32 %v3488_v24, %v3480_v14  ;;  %3321 = vmatprep.subr.mxu1 %v465_v34 }
 0x90a   :  { %v1775_v35 = vpop.permute.xlu1 %1774  ;;  %v2058_v43 = vpop.permute.xlu0 %2057 }
 0x90b   :  { %3314 = vmatprep.subr.mxu0 %v1775_v35  ;;  %3318 = vmatprep.mubr.msk.f32.mxu0 %vm468_vm1, %v1683_v25 }
 0x90c   :  { %v3490_v22 = vpop.eup %3489  ;;  %3315 = vmatpush3.msra.mxu0 %v1775_v35 }
 0x90d   :  { %v3492_v37 = vpop.eup %3491  ;;  %v1684_v40 = vmul.f32 %v3490_v22, %v3484_v17 }
 0x90e   :  { %v1773_v38 = vpop.permute.xlu1 %1772  ;;  %v1681_v39 = vmul.f32 %v3492_v37, %v3482_v16  ;;  %v1963_v55 = vpop.permute.xlu0 %1962 }
 0x90f   :  { %3316 = vmatprep.subr.mxu0 %v1773_v38 }
 0x910   :  { %v3494_v41 = vpop.eup %3493  ;;  %3311 = vmatprep.mubr.msk.f32.mxu1 %vm468_vm1, %v1681_v39  ;;  %3317 = vmatpush3.msra.mxu0 %v1773_v38 }
 0x911   :  { %3319 = vmatmul.mubr.msk.f32.vlgmr.msra.gmra.mxu0 %vm468_vm1, %v1684_v40  ;;  %3331 = vmatprep.subr.msk.mxu0 %vm468_vm1, %v1967_v36  ;;  %v1682_v42 = vmul.f32 %v3494_v41, %v3486_v31 }
 0x912   :  { %v1965_v44 = vpop.permute.xlu1 %1964  ;;  %3332 = vmatpush3.xpose.msk.msra.mxu0 %vm468_vm1, %v1967_v36  ;;  %v2052_v63 = vpop.permute.xlu0 %2051 }
 0x913   :  { %3312 = vmatmul.mubr.msk.f32.vlgmr.msra.gmra.mxu1 %vm468_vm1, %v1682_v42  ;;  %3333 = vmatprep.subr.msk.mxu0 %vm468_vm1, %v1965_v44 }
 0x914   :  { %3322 = vmatpush3.msra.mxu1 %v465_v34 }
 0x915   :  { %3323 = vmatprep.subr.mxu1 %v464_v52 }
 0x916   :  { %3324 = vmatpush3.msra.mxu1 %v464_v52  ;;  %v1961_v54 = vpop.permute.xlu1 %1960  ;;  %3334 = vmatpush3.xpose.msk.msra.mxu0 %vm468_vm1, %v1965_v44 }
 0x917   :  { %3338 = vmatprep.subr.msk.mxu1 %vm468_vm1, %v2058_v43  ;;  %3335 = vmatprep.mubr.msk.f32.mxu0 %vm468_vm1, %v1961_v54 }
 0x919   :  { %3336 = vmatmul.mubr.msk.f32.vlgmr.msra.gmra.mxu0 %vm468_vm1, %v1963_v55 }
 0x91a   :  { %v2056_v60 = vpop.permute.xlu1 %2055 }
 0x91e   :  { %v2054_v3 = vpop.permute.xlu1 %2053 }
 0x9d1   :  { %v3320_v56 = vpop.f32.mrf.mxu0 }
 0x9d3   :  { %v3313_v57 = vpop.f32.mrf.mxu1  ;;  %v1850_v59 = vpop.f32.mrf.mxu0 }
 0x9d5   :  { %v1763_v58 = vpop.f32.mrf.mxu1 }
 0x9d6   :  { %3325 = vmatprep.mubr.msk.f32.mxu1 %vm468_vm1, %v1763_v58 }
 0x9d7   :  { %3326 = vmatmul.mubr.msk.f32.vlgmr.msra.gmra.mxu1 %vm468_vm1, %v3313_v57 }
 0x9d8   :  { %3339 = vmatpush3.xpose.msk.msra.mxu1 %vm468_vm1, %v2058_v43  ;;  %3328 = vmatprep.mubr.msk.f32.mxu1 %vm468_vm1, %v1850_v59  ;;  %v467_v59 = vld [vmem:[#allocation5 + $0x38] sm:$0xff] }
 0x9d9   :  { %3340 = vmatprep.subr.msk.mxu1 %vm468_vm1, %v2056_v60  ;;  %v3337_v61 = vpop.f32.mrf.mxu0 }
 0x9da   :  { %v2143_v62 = vmul.f32 0.25, %v3337_v61 }
 0x9db   :  { %3329 = vmatmul.mubr.msk.f32.gmra.mxu1 %vm468_vm1, %v3320_v56  ;;  %v2042_v0 = vpop.f32.mrf.mxu0 }
 0x9dc   :  { %v2142_v1 = vmul.f32 0.25, %v2042_v0  ;;  %3341 = vmatpush3.xpose.msk.msra.mxu1 %vm468_vm1, %v2056_v60  ;;  %3342 = vmatprep.mubr.msk.f32.mxu1 %vm468_vm1, %v2052_v63  ;;  %v2149_v2 = vsel %vm468_vm1, %v2143_v62, -inf  ;;  %v466_v60 = vld [vmem:[#allocation5 + $0x30] sm:$0xff] }
 0x9dd   :  { %2150 = vmax.xlane.f32.xlu1 %v2149_v2  ;;  %v2986_v2 = vld [vmem:[%s4267_s5] ss:$0 sm:$0xff] }
 0x9de   :  { %v2146_v4 = vsel %vm468_vm1, %v2142_v1, -inf }
 0x9df   :  { %2147 = vmax.xlane.f32.xlu0 %v2146_v4  ;;  %3343 = vmatmul.mubr.msk.f32.vlgmr.msra.gmra.mxu1 %vm468_vm1, %v2054_v3 }
 0xa66   :  { %v2151_v5 = vpop.xlane.xlu1 %2150 }
 0xa67   :  { %v2159_v6 = vsub.f32 %v2143_v62, %v2151_v5 }
 0xa68   :  { %v2148_v11 = vpop.xlane.xlu0 %2147 }
 0xa69   :  { %v2164_v7 = vmul.f32 1.442695, %v2159_v6  ;;  %v2158_v12 = vsub.f32 %v2142_v1, %v2148_v11 }
 0xa6b   :  { %3495 = vpow2.f32 %v2164_v7  ;;  %v2162_v16 = vmul.f32 1.442695, %v2158_v12  ;;  %v3536_v12 = vld [vmem:[#allocation2] sm:$0xff] }
 0xa6d   :  { %3497 = vpow2.f32 %v2162_v16 }
 0xa78   :  { %v4068_v8 = vpop.eup %3495 }
 0xa79   :  { %v2173_v9 = vsel %vm468_vm1, %v4068_v8, 0.0 }
 0xa7a   :  { %2174 = vadd.xlane.f32.xlu1 %v2173_v9  ;;  %v3498_v51 = vpop.eup %3497 }
 0xa7b   :  { %v2170_v20 = vsel %vm468_vm1, %v3498_v51, 0.0 }
 0xa97   :  { %v3327_v14 = vpop.f32.mrf.mxu1 }
 0xa98   :  { %v4076_v17 = vadd.f32 %v3327_v14, %v1442_v13 }
 0xa99   :  { %v1937_v29 = vpop.f32.mrf.mxu1 }
 0xa9a   :  { %v4080_v31 = vadd.f32 %v1937_v29, %v1437_v15 }
 0xa9b   :  { %v3330_v32 = vpop.f32.mrf.mxu1 }
 0xa9c   :  { %v4084_v23 = vadd.f32 %v3330_v32, %v1452_v30 }
 0xa9d   :  { %v1947_v45 = vpop.f32.mrf.mxu1 }
 0xa9e   :  { %v4086_v48 = vadd.f32 %v1947_v45, %v1447_v19 }
 0xa9f   :  { %v3344_v46 = vpop.f32.mrf.mxu1 }
 0xaa0   :  { %v2145_v21 = vmul.f32 0.25, %v3344_v46  ;;  %v3538_v46 = vld [vmem:[#allocation2 + $0x18] sm:$0xff] }
 0xaa1   :  { %v2133_v49 = vpop.f32.mrf.mxu1 }
 0xaa2   :  { %v2144_v33 = vmul.f32 0.25, %v2133_v49  ;;  %v2155_v47 = vsel %vm468_vm1, %v2145_v21, -inf }
 0xaa4   :  { %v2152_v18 = vsel %vm468_vm1, %v2144_v33, -inf }
 0xaa5   :  { %2153 = vmax.xlane.f32.xlu0 %v2152_v18 }
 0xaa9   :  { %2156 = vmax.xlane.f32.xlu0 %v2155_v47 }
 0xaad   :  { %2171 = vadd.xlane.f32.xlu0 %v2170_v20 }
 0xb03   :  { %v2175_v42 = vpop.xlane.xlu1 %2174 }
 0xb2e   :  { %v2154_v50 = vpop.xlane.xlu0 %2153 }
 0xb2f   :  { %v2160_v53 = vsub.f32 %v2144_v33, %v2154_v50 }
 0xb31   :  { %v2166_v34 = vmul.f32 1.442695, %v2160_v53 }
 0xb32   :  { %v2157_v24 = vpop.xlane.xlu0 %2156 }
 0xb33   :  { %3499 = vpow2.f32 %v2166_v34  ;;  %v2161_v25 = vsub.f32 %v2145_v21, %v2157_v24 }
 0xb35   :  { %v2168_v35 = vmul.f32 1.442695, %v2161_v25 }
 0xb36   :  { %v2172_v22 = vpop.xlane.xlu0 %2171 }
 0xb37   :  { %3501 = vpow2.f32 %v2168_v35 }
 0xb38   :  { %3503 = vrcp.f32 %v2172_v22 }
 0xb39   :  { %3505 = vrcp.f32 %v2175_v42  ;;  %v2561_v42 = vld [vmem:[#allocation7 + $0x38] sm:$0xff] }
 0xb40   :  { %v3500_v36 = vpop.eup %3499 }
 0xb41   :  { %v2176_v37 = vsel %vm468_vm1, %v3500_v36, 0.0 }
 0xb42   :  { %2177 = vadd.xlane.f32.xlu0 %v2176_v37 }
 0xb44   :  { %v3502_v38 = vpop.eup %3501 }
 0xb45   :  { %v3504_v39 = vpop.eup %3503  ;;  %v2179_v40 = vsel %vm468_vm1, %v3502_v38, 0.0 }
 0xb46   :  { %2180 = vadd.xlane.f32.xlu1 %v2179_v40  ;;  %v2186_v41 = vmul.f32 %v3504_v39, %v3498_v51  ;;  %v3506_v54 = vpop.eup %3505 }
 0xb48   :  { %3349 = vmatprep.mubr.msk.f32.mxu0 %vm468_vm1, %v2186_v41 }
 0xb57   :  { %2190 = vrot.lane.b32.xlu1 %v3889_v27, %s3632_s4 }
 0xb58   :  { %2192 = vrot.lane.b32.xlu0 %v3884_v26, %s3632_s4  ;;  %v2187_v26 = vmul.f32 %v3506_v54, %v4068_v8  ;;  %v3535_v8 = vld [vmem:[#allocation2 + $0x8] sm:$0xff]  ;;  %v2557_v54 = vld [vmem:[#allocation7 + $0x18] sm:$0xff] }
 0xb5b   :  { %2279 = vrot.lane.b32.xlu1 %v3893_v28, %s3632_s4 }
 0xb5f   :  { %2277 = vrot.lane.b32.xlu1 %v3925_v10, %s3632_s4 }
 0xbcb   :  { %v2178_v43 = vpop.xlane.xlu0 %2177 }
 0xbcc   :  { %3507 = vrcp.f32 %v2178_v43  ;;  %v2560_v43 = vld [vmem:[#allocation7 + $0x30] sm:$0xff] }
 0xbcf   :  { %v2181_v44 = vpop.xlane.xlu1 %2180  ;;  %v2193_v52 = vpop.permute.xlu0 %2192 }
 0xbd0   :  { %3509 = vrcp.f32 %v2181_v44  ;;  %3345 = vmatprep.subr.mxu0 %v2193_v52  ;;  %v2559_v44 = vld [vmem:[#allocation7 + $0x28] sm:$0xff] }
 0xbd1   :  { %3346 = vmatpush3.msra.mxu0 %v2193_v52  ;;  %v2558_v52 = vld [vmem:[#allocation7 + $0x20] sm:$0xff] }
 0xbd3   :  { %v2191_v27 = vpop.permute.xlu1 %2190 }
 0xbd4   :  { %3347 = vmatprep.subr.mxu0 %v2191_v27 }
 0xbd5   :  { %3348 = vmatpush3.msra.mxu0 %v2191_v27  ;;  %v2556_v27 = vld [vmem:[#allocation7 + $0x10] sm:$0xff] }
 0xbd6   :  { %3350 = vmatmul.mubr.msk.f32.vlgmr.msra.gmra.mxu0 %vm468_vm1, %v2187_v26  ;;  %3359 = vmatprep.subr.mxu0 %v467_v59  ;;  %v2555_v26 = vld [vmem:[#allocation7 + $0x8] sm:$0xff] }
 0xbd7   :  { %v2280_v28 = vpop.permute.xlu1 %2279  ;;  %3360 = vmatpush3.msra.mxu0 %v467_v59 }
 0xbd8   :  { %3352 = vmatprep.subr.mxu1 %v2280_v28  ;;  %3361 = vmatprep.subr.mxu0 %v466_v60 }
 0xbd9   :  { %v3508_v10 = vpop.eup %3507  ;;  %3353 = vmatpush3.msra.mxu1 %v2280_v28  ;;  %3362 = vmatpush3.msra.mxu0 %v466_v60  ;;  %v2554_v28 = vld [vmem:[#allocation7] sm:$0xff] }
 0xbda   :  { %v2188_v55 = vmul.f32 %v3508_v10, %v3500_v36 }
 0xbdb   :  { %v2278_v56 = vpop.permute.xlu1 %2277 }
 0xbdc   :  { %3354 = vmatprep.subr.mxu1 %v2278_v56  ;;  %3356 = vmatprep.mubr.msk.f32.mxu1 %vm468_vm1, %v2188_v55 }
 0xbdd   :  { %v3510_v57 = vpop.eup %3509  ;;  %3355 = vmatpush3.msra.mxu1 %v2278_v56 }
 0xbde   :  { %v2189_v58 = vmul.f32 %v3510_v57, %v3502_v38  ;;  %3369 = vmatprep.subr.mxu1 %v2561_v42 }
 0xbe0   :  { %3357 = vmatmul.mubr.msk.f32.vlgmr.msra.gmra.mxu1 %vm468_vm1, %v2189_v58 }
 0xbe1   :  { %3370 = vmatpush3.msra.mxu1 %v2561_v42 }
 0xbe2   :  { %3371 = vmatprep.subr.mxu1 %v2560_v43 }
 0xbe3   :  { %3372 = vmatpush3.msra.mxu1 %v2560_v43 }
 0xbe4   :  { %3373 = vmatprep.subr.mxu1 %v2559_v44 }
 0xbe5   :  { %3374 = vmatpush3.msra.mxu1 %v2559_v44 }
 0xbe6   :  { %3375 = vmatprep.subr.mxu1 %v2558_v52 }
 0xbe7   :  { %3376 = vmatpush3.msra.mxu1 %v2558_v52 }
 0xbe8   :  { %3377 = vmatprep.subr.mxu1 %v2557_v54 }
 0xbe9   :  { %3378 = vmatpush3.msra.mxu1 %v2557_v54 }
 0xbea   :  { %3379 = vmatprep.subr.mxu1 %v2556_v27 }
 0xbeb   :  { %3380 = vmatpush3.msra.mxu1 %v2556_v27 }
 0xbec   :  { %3381 = vmatprep.subr.mxu1 %v2555_v26 }
 0xbed   :  { %3382 = vmatpush3.msra.mxu1 %v2555_v26 }
 0xbee   :  { %3383 = vmatprep.subr.mxu1 %v2554_v28 }
 0xbef   :  { %3384 = vmatpush3.msra.mxu1 %v2554_v28 }
 0xc96   :  { %v3351_v61 = vpop.f32.mrf.mxu0 }
 0xc98   :  { %v2268_v62 = vpop.f32.mrf.mxu0 }
 0xc99   :  { %3363 = vmatprep.mubr.msk.f32.mxu0 %vm468_vm1, %v2268_v62 }
 0xc9a   :  { %3364 = vmatmul.mubr.msk.f32.vlgmr.msra.gmra.mxu0 %vm468_vm1, %v3351_v61 }
 0xca0   :  { %v3358_v63 = vpop.f32.mrf.mxu1 }
 0xca2   :  { %v2355_v0 = vpop.f32.mrf.mxu1 }
 0xca3   :  { %3366 = vmatprep.mubr.msk.f32.mxu0 %vm468_vm1, %v2355_v0 }
 0xca4   :  { %3367 = vmatmul.mubr.msk.f32.gmra.mxu0 %vm468_vm1, %v3358_v63 }
 0xd5a   :  { %v3365_v1 = vpop.f32.mrf.mxu0 }
 0xd5b   :  { %v2462_v3 = vadd.f32 %v3365_v1, %v4076_v17 }
 0xd5c   :  { %v2442_v4 = vpop.f32.mrf.mxu0 }
 0xd5d   :  { %v2473_v5 = vadd.f32 %v2986_v2, %v2462_v3  ;;  %v2461_v6 = vadd.f32 %v2442_v4, %v4080_v31  ;;  %v3537_v31 = vld [vmem:[#allocation2 + $0x10] sm:$0xff]  ;;  %v2987_v4 = vld [vmem:[%s4274_s12] ss:$0 sm:$0xff] }
 0xd5f   :  { %v2472_v7 = vadd.f32 %v2986_v2, %v2461_v6  ;;  %v2477_v9 = vadd.f32 %v3535_v8, %v2473_v5  ;;  %v2988_v8 = vld [vmem:[%s4275_s13] ss:$0 sm:$0xff] }
 0xd61   :  { %v2485_v11 = vsel %vm95_vm0, %v2477_v9, 0.0  ;;  %v2476_v13 = vadd.f32 %v3536_v12, %v2472_v7 }
 0xd62   :  { %2486 = vadd.xlane.f32.xlu1 %v2485_v11 }
 0xd63   :  { %v2482_v14 = vsel %vm95_vm0, %v2476_v13, 0.0 }
 0xd64   :  { %2483 = vadd.xlane.f32.xlu0 %v2482_v14  ;;  %v3368_v15 = vpop.f32.mrf.mxu0 }
 0xd65   :  { %v2464_v16 = vadd.f32 %v3368_v15, %v4084_v23 }
 0xd66   :  { %v2452_v29 = vpop.f32.mrf.mxu0 }
 0xd67   :  { %v2463_v17 = vadd.f32 %v2452_v29, %v4086_v48  ;;  %v2475_v30 = vadd.f32 %v2986_v2, %v2464_v16 }
 0xd69   :  { %v2474_v32 = vadd.f32 %v2986_v2, %v2463_v17  ;;  %v2479_v49 = vadd.f32 %v3538_v46, %v2475_v30  ;;  %v2786_v46 = vld [vmem:[%s4270_s8 + $0x60] sm:$0xff] }
 0xd6b   :  { %v2478_v19 = vadd.f32 %v3537_v31, %v2474_v32  ;;  %v2491_v33 = vsel %vm95_vm0, %v2479_v49, 0.0  ;;  %v2789_v31 = vld [vmem:[%s4270_s8 + $0x78] sm:$0xff] }
 0xd6c   :  { %3391 = vmatprep.subr.mxu0 %v2789_v31 }
 0xd6d   :  { %v2488_v45 = vsel %vm95_vm0, %v2478_v19, 0.0  ;;  %3392 = vmatpush3.msra.mxu0 %v2789_v31 }
 0xd6e   :  { %2489 = vadd.xlane.f32.xlu0 %v2488_v45  ;;  %v2787_v45 = vld [vmem:[%s4270_s8 + $0x68] sm:$0xff] }
 0xd72   :  { %2492 = vadd.xlane.f32.xlu0 %v2491_v33  ;;  %v2784_v33 = vld [vmem:[%s4270_s8 + $0x50] sm:$0xff] }
 0xdeb   :  { %v2487_v21 = vpop.xlane.xlu1 %2486 }
 0xdec   :  { %v2495_v18 = vmul.f32 0.015625, %v2487_v21  ;;  %v2783_v21 = vld [vmem:[%s4270_s8 + $0x48] sm:$0xff] }
 0xded   :  { %v2484_v47 = vpop.xlane.xlu0 %2483 }
 0xdee   :  { %v2499_v51 = vsub.f32 %v2477_v9, %v2495_v18  ;;  %v2494_v23 = vmul.f32 0.015625, %v2484_v47  ;;  %v2782_v18 = vld [vmem:[%s4270_s8 + $0x40] sm:$0xff]  ;;  %v2781_v47 = vld [vmem:[%s4270_s8 + $0x38] sm:$0xff] }
 0xdf0   :  { %v4121_v20 = vsub.f32 %v2476_v13, %v2494_v23  ;;  %v2503_v48 = vmul.f32 %v2499_v51, %v2499_v51  ;;  %v2779_v23 = vld [vmem:[%s4270_s8 + $0x28] sm:$0xff] }
 0xdf2   :  { %v2509_v50 = vsel %vm95_vm0, %v2503_v48, 0.0  ;;  %v2502_v53 = vmul.f32 %v4121_v20, %v4121_v20  ;;  %v2777_v48 = vld [vmem:[%s4270_s8 + $0x18] sm:$0xff] }
 0xdf3   :  { %2510 = vadd.xlane.f32.xlu1 %v2509_v50  ;;  %v2776_v50 = vld [vmem:[%s4270_s8 + $0x10] sm:$0xff] }
 0xdf4   :  { %v2506_v34 = vsel %vm95_vm0, %v2502_v53, 0.0  ;;  %v2775_v53 = vld [vmem:[%s4270_s8 + $0x8] sm:$0xff] }
 0xdf5   :  { %2507 = vadd.xlane.f32.xlu0 %v2506_v34  ;;  %v2774_v34 = vld [vmem:[%s4270_s8] sm:$0xff] }
 0xdf7   :  { %v2490_v24 = vpop.xlane.xlu0 %2489 }
 0xdf8   :  { %v2496_v25 = vmul.f32 0.015625, %v2490_v24  ;;  %v2989_v24 = vld [vmem:[%s4269_s7] ss:$0 sm:$0xff] }
 0xdfa   :  { %v4127_v35 = vsub.f32 %v2478_v19, %v2496_v25  ;;  %v2788_v19 = vld [vmem:[%s4270_s8 + $0x70] sm:$0xff] }
 0xdfb   :  { %v2493_v22 = vpop.xlane.xlu0 %2492  ;;  %3393 = vmatprep.subr.mxu0 %v2788_v19 }
 0xdfc   :  { %v2497_v36 = vmul.f32 0.015625, %v2493_v22  ;;  %v2504_v37 = vmul.f32 %v4127_v35, %v4127_v35  ;;  %3394 = vmatpush3.msra.mxu0 %v2788_v19 }
 0xdfd   :  { %3395 = vmatprep.subr.mxu0 %v2787_v45 }
 0xdfe   :  { %v4131_v38 = vsub.f32 %v2479_v49, %v2497_v36  ;;  %v2512_v39 = vsel %vm95_vm0, %v2504_v37, 0.0  ;;  %3396 = vmatpush3.msra.mxu0 %v2787_v45  ;;  %v2785_v49 = vld [vmem:[%s4270_s8 + $0x58] sm:$0xff] }
 0xdff   :  { %2513 = vadd.xlane.f32.xlu0 %v2512_v39  ;;  %3397 = vmatprep.subr.mxu0 %v2786_v46 }
 0xe00   :  { %v2505_v40 = vmul.f32 %v4131_v38, %v4131_v38  ;;  %3398 = vmatpush3.msra.mxu0 %v2786_v46 }
 0xe01   :  { %3399 = vmatprep.subr.mxu0 %v2785_v49 }
 0xe02   :  { %v2515_v41 = vsel %vm95_vm0, %v2505_v40, 0.0  ;;  %3400 = vmatpush3.msra.mxu0 %v2785_v49 }
 0xe03   :  { %2516 = vadd.xlane.f32.xlu1 %v2515_v41  ;;  %3401 = vmatprep.subr.mxu0 %v2784_v33 }
 0xe04   :  { %3402 = vmatpush3.msra.mxu0 %v2784_v33 }
 0xe05   :  { %3403 = vmatprep.subr.mxu0 %v2783_v21 }
 0xe06   :  { %3404 = vmatpush3.msra.mxu0 %v2783_v21 }
 0xe07   :  { %3405 = vmatprep.subr.mxu0 %v2782_v18 }
 0xe08   :  { %3406 = vmatpush3.msra.mxu0 %v2782_v18 }
 0xe09   :  { %3407 = vmatprep.subr.mxu0 %v2781_v47 }
 0xe0a   :  { %3408 = vmatpush3.msra.mxu0 %v2781_v47 }
 0xe7c   :  { %v2511_v10 = vpop.xlane.xlu1 %2510 }
 0xe7d   :  { %v2519_v55 = vmul.f32 0.015625, %v2511_v10 }
 0xe7e   :  { %v2508_v56 = vpop.xlane.xlu0 %2507 }
 0xe7f   :  { %v2523_v57 = vadd.f32 1e-05, %v2519_v55  ;;  %v2518_v58 = vmul.f32 0.015625, %v2508_v56 }
 0xe81   :  { %3511 = vrsqrt.f32 %v2523_v57  ;;  %v2522_v59 = vadd.f32 1e-05, %v2518_v58 }
 0xe83   :  { %3513 = vrsqrt.f32 %v2522_v59 }
 0xe88   :  { %v2514_v60 = vpop.xlane.xlu0 %2513 }
 0xe89   :  { %v2520_v61 = vmul.f32 0.015625, %v2514_v60 }
 0xe8b   :  { %v2524_v62 = vadd.f32 1e-05, %v2520_v61 }
 0xe8c   :  { %v2517_v63 = vpop.xlane.xlu1 %2516 }
 0xe8d   :  { %3515 = vrsqrt.f32 %v2524_v62  ;;  %v2521_v0 = vmul.f32 0.015625, %v2517_v63 }
 0xe8e   :  { %v3512_v1 = vpop.eup %3511 }
 0xe8f   :  { %v2531_v2 = vmul.f32 %v3512_v1, %v2499_v51  ;;  %v2525_v3 = vadd.f32 1e-05, %v2521_v0  ;;  %v2780_v51 = vld [vmem:[%s4270_s8 + $0x30] sm:$0xff] }
 0xe90   :  { %v3514_v5 = vpop.eup %3513  ;;  %3409 = vmatprep.subr.mxu0 %v2780_v51 }
 0xe91   :  { %3517 = vrsqrt.f32 %v2525_v3  ;;  %v2530_v6 = vmul.f32 %v3514_v5, %v4121_v20  ;;  %v2541_v7 = vmul.f32 %v2987_v4, %v2531_v2  ;;  %3410 = vmatpush3.msra.mxu0 %v2780_v51  ;;  %v2778_v20 = vld [vmem:[%s4270_s8 + $0x20] sm:$0xff] }
 0xe92   :  { %3411 = vmatprep.subr.mxu0 %v2779_v23 }
 0xe93   :  { %v2540_v9 = vmul.f32 %v2987_v4, %v2530_v6  ;;  %v4146_v12 = vadd.f32 %v2988_v8, %v2541_v7  ;;  %3412 = vmatpush3.msra.mxu0 %v2779_v23 }
 0xe94   :  { %3413 = vmatprep.subr.mxu0 %v2778_v20 }
 0xe95   :  { %v4144_v11 = vadd.f32 %v2988_v8, %v2540_v9  ;;  %3414 = vmatpush3.msra.mxu0 %v2778_v20 }
 0xe96   :  { %3415 = vmatprep.subr.mxu0 %v2777_v48 }
 0xe97   :  { %3385 = vmatprep.mubr.msk.f32.mxu1 %vm95_vm0, %v4144_v11  ;;  %3416 = vmatpush3.msra.mxu0 %v2777_v48 }
 0xe98   :  { %3386 = vmatmul.mubr.msk.f32.vlgmr.msra.gmra.mxu1 %vm95_vm0, %v4146_v12  ;;  %3417 = vmatprep.subr.mxu0 %v2776_v50 }
 0xe99   :  { %3418 = vmatpush3.msra.mxu0 %v2776_v50 }
 0xe9a   :  { %v3516_v13 = vpop.eup %3515  ;;  %3419 = vmatprep.subr.mxu0 %v2775_v53 }
 0xe9b   :  { %v2532_v14 = vmul.f32 %v3516_v13, %v4127_v35  ;;  %3420 = vmatpush3.msra.mxu0 %v2775_v53 }
 0xe9c   :  { %3421 = vmatprep.subr.mxu0 %v2774_v34 }
 0xe9d   :  { %v2542_v15 = vmul.f32 %v2987_v4, %v2532_v14  ;;  %3422 = vmatpush3.msra.mxu0 %v2774_v34 }
 0xe9e   :  { %v3518_v16 = vpop.eup %3517 }
 0xe9f   :  { %v4153_v29 = vadd.f32 %v2988_v8, %v2542_v15  ;;  %v2533_v17 = vmul.f32 %v3518_v16, %v4131_v38 }
 0xea1   :  { %3388 = vmatprep.mubr.msk.f32.mxu1 %vm95_vm0, %v4153_v29  ;;  %v2543_v30 = vmul.f32 %v2987_v4, %v2533_v17 }
 0xea3   :  { %v4158_v32 = vadd.f32 %v2988_v8, %v2543_v30 }
 0xea5   :  { %3389 = vmatmul.mubr.msk.f32.gmra.mxu1 %vm95_vm0, %v4158_v32 }
 0xf58   :  { %v3387_v25 = vpop.f32.mrf.mxu1 }
 0xf59   :  { %v4213_v35 = vadd.f32 %v3387_v25, %v2989_v24 }
 0xf5a   :  { %v2647_v22 = vpop.f32.mrf.mxu1 }
 0xf5b   :  { %v4216_v36 = vmul.f32 0.70710677, %v4213_v35  ;;  %v4218_v37 = vadd.f32 %v2989_v24, %v2647_v22 }
 0xf5d   :  { %v2683_v38 = vand.u32 2147483647, %v4216_v36  ;;  %v4222_v39 = vmul.f32 0.70710677, %v4218_v37  ;;  %vm2675_vm2 = vcmp.ge.f32.partialorder %v4216_v36, 0.0 }
 0xf5f   :  { %v2687_v40 = vmul.f32 0.3275911, %v2683_v38  ;;  %v2682_v41 = vand.u32 2147483647, %v4222_v39  ;;  %v2739_v10 = vsub.f32 0.0, %v2683_v38  ;;  %vm2674_vm3 = vcmp.ge.f32.partialorder %v4222_v39, 0.0 }
 0xf61   :  { %v2691_v42 = vadd.f32 1.0, %v2687_v40  ;;  %v2686_v43 = vmul.f32 0.3275911, %v2682_v41  ;;  %v2738_v57 = vsub.f32 0.0, %v2682_v41  ;;  %v2743_v60 = vmul.f32 %v2739_v10, %v2683_v38 }
 0xf63   :  { %3519 = vrcp.f32 %v2691_v42  ;;  %v2690_v44 = vadd.f32 1.0, %v2686_v43  ;;  %v2742_v0 = vmul.f32 %v2738_v57, %v2682_v41  ;;  %v2748_v3 = vmul.f32 1.442695, %v2743_v60 }
 0xf65   :  { %v3390_v52 = vpop.f32.mrf.mxu1  ;;  %3521 = vrcp.f32 %v2690_v44  ;;  %v2746_v6 = vmul.f32 1.442695, %v2742_v0 }
 0xf66   :  { %v4225_v54 = vadd.f32 %v3390_v52, %v2989_v24 }
 0xf67   :  { %v2657_v27 = vpop.f32.mrf.mxu1 }
 0xf68   :  { %v4228_v26 = vmul.f32 0.70710677, %v4225_v54  ;;  %v4230_v28 = vadd.f32 %v2989_v24, %v2657_v27  ;;  %v3633_v27 = vmov -1.0  }
 0xf69   :  { %v2679_v10 = vsel %vm2675_vm2, 1.0, %v3633_v27 }
 0xf6a   :  { %v2685_v55 = vand.u32 2147483647, %v4228_v26  ;;  %v4234_v56 = vmul.f32 0.70710677, %v4230_v28  ;;  %vm2677_vm4 = vcmp.ge.f32.partialorder %v4228_v26, 0.0  ;;  %v2669_v26 = vmul.f32 0.5, %v4225_v54 }
 0xf6c   :  { %v2689_v58 = vmul.f32 0.3275911, %v2685_v55  ;;  %v2684_v59 = vand.u32 2147483647, %v4234_v56  ;;  %v2741_v9 = vsub.f32 0.0, %v2685_v55  ;;  %vm2676_vm5 = vcmp.ge.f32.partialorder %v4234_v56, 0.0 }
 0xf6e   :  { %v2693_v61 = vadd.f32 1.0, %v2689_v58  ;;  %v2688_v62 = vmul.f32 0.3275911, %v2684_v59  ;;  %v2740_v17 = vsub.f32 0.0, %v2684_v59  ;;  %v2745_v30 = vmul.f32 %v2741_v9, %v2685_v55 }
 0xf70   :  { %v3520_v63 = vpop.eup %3519  ;;  %3523 = vrcp.f32 %v2693_v61  ;;  %v2692_v1 = vadd.f32 1.0, %v2688_v62  ;;  %v2744_v33 = vmul.f32 %v2740_v17, %v2684_v59  ;;  %v2752_v21 = vmul.f32 1.442695, %v2745_v30 }
 0xf71   :  { %v2703_v2 = vmul.f32 1.0614054, %v3520_v63  ;;  %v2678_v62 = vsel %vm2674_vm3, 1.0, %v3633_v27 }
 0xf72   :  { %v3522_v4 = vpop.eup %3521  ;;  %3525 = vrcp.f32 %v2692_v1  ;;  %v2750_v53 = vmul.f32 1.442695, %v2744_v33  ;;  %v2668_v33 = vmul.f32 0.5, %v4230_v28 }
 0xf73   :  { %v2707_v5 = vadd.f32 -1.4531521, %v2703_v2  ;;  %v2702_v7 = vmul.f32 1.0614054, %v3522_v4  ;;  %3527 = vpow2.f32 %v2748_v3  ;;  %v2666_v3 = vmul.f32 0.5, %v4218_v37 }
 0xf74   :  { %3529 = vpow2.f32 %v2746_v6  ;;  %v2667_v6 = vmul.f32 0.5, %v4213_v35 }
 0xf75   :  { %v2711_v8 = vmul.f32 %v3520_v63, %v2707_v5  ;;  %v2706_v13 = vadd.f32 -1.4531521, %v2702_v7  ;;  %3531 = vpow2.f32 %v2752_v21 }
 0xf76   :  { %3533 = vpow2.f32 %v2750_v53 }
 0xf77   :  { %v2715_v14 = vadd.f32 1.4214138, %v2711_v8  ;;  %v2710_v15 = vmul.f32 %v3522_v4, %v2706_v13 }
 0xf79   :  { %v2719_v16 = vmul.f32 %v3520_v63, %v2715_v14  ;;  %v2714_v31 = vadd.f32 1.4214138, %v2710_v15 }
 0xf7b   :  { %v2723_v19 = vadd.f32 -0.28449672, %v2719_v16  ;;  %v2718_v45 = vmul.f32 %v3522_v4, %v2714_v31  ;;  %v2681_v31 = vsel %vm2677_vm4, 1.0, %v3633_v27 }
 0xf7d   :  { %v3524_v46 = vpop.eup %3523  ;;  %v2727_v49 = vmul.f32 %v3520_v63, %v2723_v19  ;;  %v2722_v18 = vadd.f32 -0.28449672, %v2718_v45  ;;  %v2680_v45 = vsel %vm2676_vm5, 1.0, %v3633_v27 }
 0xf7e   :  { %v2705_v47 = vmul.f32 1.0614054, %v3524_v46 }
 0xf7f   :  { %v2731_v51 = vadd.f32 0.2548296, %v2727_v49  ;;  %v3526_v23 = vpop.eup %3525  ;;  %v2726_v20 = vmul.f32 %v3522_v4, %v2722_v18 }
 0xf80   :  { %v2709_v48 = vadd.f32 -1.4531521, %v2705_v47  ;;  %v2704_v34 = vmul.f32 1.0614054, %v3526_v23  ;;  %v3528_v24 = vpop.eup %3527 }
 0xf81   :  { %v2735_v50 = vmul.f32 %v3520_v63, %v2731_v51  ;;  %v2730_v25 = vadd.f32 0.2548296, %v2726_v20  ;;  %v3530_v43 = vpop.eup %3529  ;;  %v2994_v51 = vld [vmem:[%s4271_s9] ss:$0 sm:$0xff]  ;;  %s3599_s9 = scalar_lea.vmem %s2896_s21, 512 }
 0xf82   :  { %v2713_v22 = vmul.f32 %v3524_v46, %v2709_v48  ;;  %v2708_v40 = vadd.f32 -1.4531521, %v2704_v34  ;;  %v3532_v9 = vpop.eup %3531  ;;  %p3600_p1 = scmp.ne.s32.totalorder %s2896_s21, %s3599_s9  ;;  %p3605_p3 = scmp.lt.s32.totalorder %s3599_s9, %s3599_s9 }
 0xf83   :  { %v2755_v38 = vmul.f32 %v3528_v24, %v2735_v50  ;;  %v2734_v41 = vmul.f32 %v3522_v4, %v2730_v25  ;;  %v3534_v17 = vpop.eup %3533 }
 0xf84   :  { %v2717_v42 = vadd.f32 1.4214138, %v2713_v22  ;;  %v2712_v52 = vmul.f32 %v3526_v23, %v2708_v40  ;;  %p3606_p4 = por %p3605_p3, %p3604_p2 }
 0xf85   :  { %v2759_v44 = vsub.f32 1.0, %v2755_v38  ;;  %v2754_v55 = vmul.f32 %v3530_v43, %v2734_v41 }
 0xf86   :  { %v2721_v57 = vmul.f32 %v3524_v46, %v2717_v42  ;;  %v2716_v59 = vadd.f32 1.4214138, %v2712_v52  ;;  %p3607_p5 = pnand %p3606_p4, %p3600_p1 }
 0xf87   :  { %v2763_v58 = vmul.f32 %v2759_v44, %v2679_v10  ;;  %v2758_v60 = vsub.f32 1.0, %v2754_v55 }
 0xf88   :  { %v2725_v61 = vadd.f32 -0.28449672, %v2721_v57  ;;  %v2720_v36 = vmul.f32 %v3526_v23, %v2716_v59 }
 0xf89   :  { %v2762_v63 = vmul.f32 %v2758_v60, %v2678_v62  ;;  %v2767_v1 = vadd.f32 1.0, %v2763_v58 }
 0xf8a   :  { %v2729_v0 = vmul.f32 %v3524_v46, %v2725_v61  ;;  %v2724_v2 = vadd.f32 -0.28449672, %v2720_v36 }
 0xf8b   :  { %v2766_v4 = vadd.f32 1.0, %v2762_v63  ;;  %v2771_v13 = vmul.f32 %v2767_v1, %v2667_v6 }
 0xf8c   :  { %v2733_v5 = vadd.f32 0.2548296, %v2729_v0  ;;  %v2728_v7 = vmul.f32 %v3526_v23, %v2724_v2 }
 0xf8d   :  { %v2770_v39 = vmul.f32 %v2766_v4, %v2666_v3 }
 0xf8e   :  { %v2737_v8 = vmul.f32 %v3524_v46, %v2733_v5  ;;  %v2732_v14 = vadd.f32 0.2548296, %v2728_v7 }
 0xf8f   :  { %3423 = vmatprep.mubr.f32.mxu0 %v2770_v39 }
 0xf90   :  { %v2757_v15 = vmul.f32 %v3532_v9, %v2737_v8  ;;  %3424 = vmatmul.mubr.f32.vlgmr.msra.gmra.mxu0 %v2771_v13  ;;  %v2736_v16 = vmul.f32 %v3526_v23, %v2732_v14 }
 0xf92   :  { %v2761_v30 = vsub.f32 1.0, %v2757_v15  ;;  %v2756_v37 = vmul.f32 %v3534_v17, %v2736_v16 }
 0xf94   :  { %v2765_v19 = vmul.f32 %v2761_v30, %v2681_v31  ;;  %v2760_v35 = vsub.f32 1.0, %v2756_v37 }
 0xf96   :  { %v2764_v49 = vmul.f32 %v2760_v35, %v2680_v45  ;;  %v2769_v46 = vadd.f32 1.0, %v2765_v19 }
 0xf98   :  { %v2768_v21 = vadd.f32 1.0, %v2764_v49  ;;  %v2773_v47 = vmul.f32 %v2769_v46, %v2669_v26 }
 0xf9a   :  { %v2772_v18 = vmul.f32 %v2768_v21, %v2668_v33 }
 0xf9c   :  { %3426 = vmatprep.mubr.f32.mxu0 %v2772_v18 }
 0xf9d   :  { %3427 = vmatmul.mubr.f32.gmra.mxu0 %v2773_v47 }
0x1050   :  { %v3425_v56 = vpop.f32.mrf.mxu0 }
0x1051   :  { %v2869_v23 = vadd.f32 %v3425_v56, %v2994_v51 }
0x1052   :  { %v2863_v20 = vpop.f32.mrf.mxu0 }
0x1053   :  { %v2883_v48 = vadd.f32 %v2869_v23, %v4146_v12  ;;  %v2864_v50 = vadd.f32 %v2994_v51, %v2863_v20 }
0x1055   :  { %2887 = vst.msk [vmem:[#allocation8 + $0x8] sm:$0xff] %vm95_vm0, %v2883_v48  ;;  %v2882_v28 = vadd.f32 %v2864_v50, %v4144_v11 }
0x1057   :  { %2886 = vst.msk [vmem:[#allocation8] sm:$0xff] %vm95_vm0, %v2882_v28 }
0x105d   :  { %v3428_v54 = vpop.f32.mrf.mxu0 }
0x105e   :  { %v2879_v53 = vadd.f32 %v3428_v54, %v2994_v51 }
0x105f   :  { %v2873_v34 = vpop.f32.mrf.mxu0 }
0x1060   :  { %v2885_v24 = vadd.f32 %v2879_v53, %v4158_v32  ;;  %v2874_v25 = vadd.f32 %v2994_v51, %v2873_v34 }
0x1062   :  { %2889 = vst.msk [vmem:[#allocation8 + $0x18] sm:$0xff] %vm95_vm0, %v2885_v24  ;;  %v2884_v22 = vadd.f32 %v2874_v25, %v4153_v29 }
0x1064   :  { %2888 = vst.msk [vmem:[#allocation8 + $0x10] sm:$0xff] %vm95_vm0, %v2884_v22 }
0x1065   :  { %3610 = shalt.err (!%p3607_p5)
}
0x1066   :  { %2901 = dma.vmem_to_hbm [thread:$0]  %s2896_s21, 512, %s4276_s14, [#allocation4], %s3627_s18, %s3627_s18, %s3628_s19  }
0x1067   :  { %3623 = dma.done.wait [#allocation4], 512  }
0x1068   :  { %3624 = vsyncadd [#allocation4], 4294966784 }
0x1069   :  { %2905 = vsyncpa [#allocation3], 1 }
0x106a   :  { %2906 = vsyncpa [#allocation6], 1 }
0x106b   :  { %2907 = vsyncpa [#allocation4], 1 }

</bundles_post_ra>
